<compile_context>
chip_gen: v6e
topology: v6e:2x2x1
jax: 0.10.0
libtpu: 0.0.40
codegen_flags: <defaults>
</compile_context>

<pallas_src>
import jax
import jax.numpy as jnp
from jax.experimental import pallas as pl
from jax.experimental.pallas import tpu as pltpu

EMB_DIM = 256                   # embedding_dim from the module
BERT_DIM = 768                  # bert-base-uncased hidden size
COMB_DIM = EMB_DIM + BERT_DIM   # 1024
HID_DIM = 512                   # fc1 out features
OUT_DIM = 3                     # output_dim from the module
OUT_PAD = 128                   # lane-dense padded fc2 output width


def _round_up(x, m):
    return (x + m - 1) // m * m


def formant_kernel(emb_ref, cls_ref, w1a_ref, w1b_ref, b1_ref, w2_ref, b2_ref,
                   combined_ref, out_ref):
    emb = emb_ref[...]          # (TB, 256) f32
    cls = cls_ref[...]          # (TB, 768) f32

    # combined = concat(emb, cls): two aligned slice stores (256 and 768 are
    # multiples of 128 -> unmasked vst); no concat temp materialized.
    combined_ref[:, :EMB_DIM] = emb
    combined_ref[:, EMB_DIM:] = cls

    # fc1 split across the concat boundary; bf16 weights/activations on the
    # MXU, f32 accumulation.
    h = jnp.dot(emb.astype(jnp.bfloat16), w1a_ref[...],
                preferred_element_type=jnp.float32)
    h = h + jnp.dot(cls.astype(jnp.bfloat16), w1b_ref[...],
                    preferred_element_type=jnp.float32)
    h = jnp.maximum(h + b1_ref[...], 0.0)              # (TB, 512) f32

    # TODO(synk): dropout is identity (eval mode); a training-mode kernel would
    # need pltpu.prng_seed/prng_random_bits masking.

    # fc2 in bf16 (f32 accumulation) into a lane-dense (TB, 128) block
    # (W2/b2 zero-padded to 128 cols in prepare_formant_weights).
    out_ref[...] = jnp.dot(h.astype(jnp.bfloat16), w2_ref[...],
                           preferred_element_type=jnp.float32) + b2_ref[...]


def prepare_formant_weights(w1, b1, w2, b2):
    """One-time (parameter-load-time) weight transformation.

    w1: (1024, 512), b1: (512,) or (1, 512), w2: (512, 3), b2: (3,) or (1, 3);
    weights stored pre-transposed as (in_features, out_features).
    Returns (w1a bf16 (256,512), w1b bf16 (768,512), b1 f32 (1,512),
             w2p bf16 (512,128), b2p f32 (1,128))."""
    w1 = jnp.asarray(w1, jnp.float32)
    w2 = jnp.asarray(w2, jnp.float32)
    assert w1.shape == (COMB_DIM, HID_DIM), f"w1 shape {w1.shape}"
    assert w2.shape == (HID_DIM, OUT_DIM), f"w2 shape {w2.shape}"
    b1 = jnp.asarray(b1, jnp.float32).reshape(1, HID_DIM)
    b2 = jnp.asarray(b2, jnp.float32).reshape(1, OUT_DIM)

    w1a = w1[:EMB_DIM].astype(jnp.bfloat16)                       # (256, 512)
    w1b = w1[EMB_DIM:].astype(jnp.bfloat16)                       # (768, 512)
    w2p = jnp.pad(w2.astype(jnp.bfloat16),
                  ((0, 0), (0, OUT_PAD - OUT_DIM)))               # (512, 128)
    b2p = jnp.pad(b2, ((0, 0), (0, OUT_PAD - OUT_DIM)))           # (1, 128)
    return w1a, w1b, b1, w2p, b2p


def formant_predictor(embeddings, bert_cls, w1a, w1b, b1, w2p, b2p):
    """embeddings: (B, 256) f32; bert_cls: (B, 768) f32 (BERT CLS vector).
    Weights already transformed by prepare_formant_weights().
    Returns (combined (B, 1024) f32, output (B, 3) f32)."""
    B = embeddings.shape[0]

    # Adaptive batch tile:
    #  * B <= 128: one grid step, 16-row floor (bf16 native (16,128) sublane
    #    tile -> no compiler relayout), padding waste < 16 rows.
    #  * B > 128: 128-multiple tile capped at 1024 rows, chosen from ceil(B/2)
    #    so there are ALWAYS >= 2 grid steps -> the "parallel" axis shards
    #    across both v7x TensorCores; padding waste bounded by < TB rows.
    if B <= 128:
        TB = _round_up(max(B, 1), 16)
    else:
        TB = min(1024, _round_up(pl.cdiv(B, 2), 128))
    Bp = _round_up(B, TB)
    if Bp != B:
        pad = Bp - B
        embeddings = jnp.pad(embeddings, ((0, pad), (0, 0)))
        bert_cls = jnp.pad(bert_cls, ((0, pad), (0, 0)))

    grid = (Bp // TB,)
    flops = 2 * Bp * COMB_DIM * HID_DIM + 2 * Bp * HID_DIM * OUT_PAD
    bytes_accessed = (Bp * (EMB_DIM + BERT_DIM + COMB_DIM + OUT_PAD) * 4
                      + (EMB_DIM + BERT_DIM) * HID_DIM * 2    # W1a/W1b bf16
                      + HID_DIM * OUT_PAD * 2                 # W2 bf16
                      + (HID_DIM + OUT_PAD) * 4)              # biases f32

    combined, out_pad = pl.pallas_call(
        formant_kernel,
        out_shape=(
            jax.ShapeDtypeStruct((Bp, COMB_DIM), jnp.float32),
            jax.ShapeDtypeStruct((Bp, OUT_PAD), jnp.float32),
        ),
        grid_spec=pltpu.PrefetchScalarGridSpec(
            num_scalar_prefetch=0,
            grid=grid,
            in_specs=[
                pl.BlockSpec((TB, EMB_DIM), lambda i: (i, 0)),       # emb tile
                pl.BlockSpec((TB, BERT_DIM), lambda i: (i, 0)),      # cls tile
                pl.BlockSpec((EMB_DIM, HID_DIM), lambda i: (0, 0)),  # W1a (resident)
                pl.BlockSpec((BERT_DIM, HID_DIM), lambda i: (0, 0)), # W1b (resident)
                pl.BlockSpec((1, HID_DIM), lambda i: (0, 0)),        # b1  (resident)
                pl.BlockSpec((HID_DIM, OUT_PAD), lambda i: (0, 0)),  # W2p (resident)
                pl.BlockSpec((1, OUT_PAD), lambda i: (0, 0)),        # b2p (resident)
            ],
            out_specs=[
                pl.BlockSpec((TB, COMB_DIM), lambda i: (i, 0)),      # combined
                pl.BlockSpec((TB, OUT_PAD), lambda i: (i, 0)),       # output (padded)
            ],
        ),
        compiler_params=pltpu.CompilerParams(
            dimension_semantics=("parallel",),
            vmem_limit_bytes=48 << 20),
        cost_estimate=pl.CostEstimate(flops=flops, transcendentals=0,
                                      bytes_accessed=bytes_accessed),
    )(embeddings, bert_cls, w1a, w1b, b1, w2p, b2p)

    return combined[:B], out_pad[:B, :OUT_DIM]


def reference(embeddings, bert_cls, w1, b1, w2, b2):
    combined = jnp.concatenate([embeddings, bert_cls], axis=-1)
    hidden = jnp.maximum(combined @ w1 + b1, 0.0)
    return combined, hidden @ w2 + b2


if __name__ == "__main__":
    key = jax.random.PRNGKey(0)
    k_emb, k_cls, k_w1, k_b1, k_w2, k_b2 = jax.random.split(key, 6)

    B = 8  # small batch
    embeddings = jax.random.normal(k_emb, (B, EMB_DIM), dtype=jnp.float32)
    # TODO(synk): stands in for self.bert(...).last_hidden_state[:, 0, :]
    bert_cls = jax.random.normal(k_cls, (B, BERT_DIM), dtype=jnp.float32)

    # Deterministic parameter init (shapes from nn.Linear in __init__),
    # stored transposed: (in_features, out_features).
    w1 = jax.random.normal(k_w1, (COMB_DIM, HID_DIM), dtype=jnp.float32) * 0.02
    b1 = jax.random.normal(k_b1, (1, HID_DIM), dtype=jnp.float32) * 0.02
    w2 = jax.random.normal(k_w2, (HID_DIM, OUT_DIM), dtype=jnp.float32) * 0.02
    b2 = jax.random.normal(k_b2, (1, OUT_DIM), dtype=jnp.float32) * 0.02

    # Weight prep runs once (parameter load time), not per forward call.
    prepared = prepare_formant_weights(w1, b1, w2, b2)
    fwd = jax.jit(formant_predictor)

    combined, output = jax.block_until_ready(
        fwd(embeddings, bert_cls, *prepared))

    # Correctness check against a pure-JAX f32 reference.
    ref_combined, ref_output = reference(embeddings, bert_cls, w1, b1, w2, b2)
    assert combined.shape == (B, COMB_DIM)
    assert output.shape == (B, OUT_DIM)
    assert jnp.allclose(combined, ref_combined, atol=1e-6)
    # fc1/fc2 use bf16 weights/activations with f32 accumulation -> tolerance.
    assert jnp.allclose(output, ref_output, atol=2e-2, rtol=2e-2)

    print("KERNEL_OK")
</pallas_src>

<mosaic_0001>
module attributes {stable_mosaic.version = 11 : i64} {
  func.func @formant_kernel(%arg0: i32, %arg1: memref<16x256xf32, #tpu.memory_space<vmem>>, %arg2: memref<16x768xf32, #tpu.memory_space<vmem>>, %arg3: memref<256x512xbf16, #tpu.memory_space<vmem>>, %arg4: memref<768x512xbf16, #tpu.memory_space<vmem>>, %arg5: memref<1x512xf32, #tpu.memory_space<vmem>>, %arg6: memref<512x128xbf16, #tpu.memory_space<vmem>>, %arg7: memref<1x128xf32, #tpu.memory_space<vmem>>, %arg8: memref<16x1024xf32, #tpu.memory_space<vmem>>, %arg9: memref<16x128xf32, #tpu.memory_space<vmem>>) attributes {dimension_semantics = [#tpu.dimension_semantics<parallel>], iteration_bounds = array<i64: 1>, scalar_prefetch = 0 : i64, scratch_operands = 0 : i64, tpu.core_type = #tpu.core_type<tc>, window_params = [{transform_indices = @transform_0, window_bounds = array<i64: 16, 256>}, {transform_indices = @transform_1, window_bounds = array<i64: 16, 768>}, {pipeline_mode = #tpu.pipeline_mode<synchronous>, transform_indices = @transform_2, window_bounds = array<i64: 256, 512>}, {pipeline_mode = #tpu.pipeline_mode<synchronous>, transform_indices = @transform_3, window_bounds = array<i64: 768, 512>}, {pipeline_mode = #tpu.pipeline_mode<synchronous>, transform_indices = @transform_4, window_bounds = array<i64: 1, 512>}, {pipeline_mode = #tpu.pipeline_mode<synchronous>, transform_indices = @transform_5, window_bounds = array<i64: 512, 128>}, {pipeline_mode = #tpu.pipeline_mode<synchronous>, transform_indices = @transform_6, window_bounds = array<i64: 1, 128>}, {transform_indices = @transform_7, window_bounds = array<i64: 16, 1024>}, {transform_indices = @transform_8, window_bounds = array<i64: 16, 128>}]} {
    %c0 = arith.constant 0 : index
    %c0_0 = arith.constant 0 : index
    %0 = vector.load %arg1[%c0, %c0_0] : memref<16x256xf32, #tpu.memory_space<vmem>>, vector<16x256xf32>
    %c0_1 = arith.constant 0 : index
    %c0_2 = arith.constant 0 : index
    %1 = vector.load %arg2[%c0_1, %c0_2] : memref<16x768xf32, #tpu.memory_space<vmem>>, vector<16x768xf32>
    %c0_3 = arith.constant 0 : index
    %c0_4 = arith.constant 0 : index
    %2 = vector.load %arg8[%c0_3, %c0_4] : memref<16x1024xf32, #tpu.memory_space<vmem>>, vector<16x256xf32>
    tpu.vector_store %arg8[%c0_3, %c0_4], %0 {strides = array<i32>} : memref<16x1024xf32, #tpu.memory_space<vmem>>, vector<16x256xf32>,
    %c0_5 = arith.constant 0 : index
    %c256 = arith.constant 256 : index
    %3 = vector.load %arg8[%c0_5, %c256] : memref<16x1024xf32, #tpu.memory_space<vmem>>, vector<16x768xf32>
    tpu.vector_store %arg8[%c0_5, %c256], %1 {strides = array<i32>} : memref<16x1024xf32, #tpu.memory_space<vmem>>, vector<16x768xf32>,
    %4 = arith.truncf %0 : vector<16x256xf32> to vector<16x256xbf16>
    %c0_6 = arith.constant 0 : index
    %c0_7 = arith.constant 0 : index
    %5 = vector.load %arg3[%c0_6, %c0_7] : memref<256x512xbf16, #tpu.memory_space<vmem>>, vector<256x512xbf16>
    %cst = arith.constant dense<0.000000e+00> : vector<16x512xf32>
    %6 = tpu.matmul %4, %5, %cst {dimension_numbers = #tpu.dot_dimension_numbers<[1], [0], [0], [1], [0, 0, 1, 1], [], []>} : vector<16x256xbf16>, vector<256x512xbf16>, vector<16x512xf32> -> vector<16x512xf32>
    %7 = arith.truncf %1 : vector<16x768xf32> to vector<16x768xbf16>
    %c0_8 = arith.constant 0 : index
    %c0_9 = arith.constant 0 : index
    %8 = vector.load %arg4[%c0_8, %c0_9] : memref<768x512xbf16, #tpu.memory_space<vmem>>, vector<768x512xbf16>
    %cst_10 = arith.constant dense<0.000000e+00> : vector<16x512xf32>
    %9 = tpu.matmul %7, %8, %cst_10 {dimension_numbers = #tpu.dot_dimension_numbers<[1], [0], [0], [1], [0, 0, 1, 1], [], []>} : vector<16x768xbf16>, vector<768x512xbf16>, vector<16x512xf32> -> vector<16x512xf32>
    %10 = arith.addf %6, %9 : vector<16x512xf32>
    %c0_11 = arith.constant 0 : index
    %c0_12 = arith.constant 0 : index
    %11 = vector.load %arg5[%c0_11, %c0_12] : memref<1x512xf32, #tpu.memory_space<vmem>>, vector<1x512xf32>
    %12 = vector.broadcast %11 : vector<1x512xf32> to vector<16x512xf32>
    %13 = arith.addf %10, %12 : vector<16x512xf32>
    %cst_13 = arith.constant 0.000000e+00 : f32
    %14 = vector.broadcast %cst_13 : f32 to vector<16x512xf32>
    %15 = arith.maximumf %13, %14 : vector<16x512xf32>
    %16 = arith.truncf %15 : vector<16x512xf32> to vector<16x512xbf16>
    %c0_14 = arith.constant 0 : index
    %c0_15 = arith.constant 0 : index
    %17 = vector.load %arg6[%c0_14, %c0_15] : memref<512x128xbf16, #tpu.memory_space<vmem>>, vector<512x128xbf16>
    %cst_16 = arith.constant dense<0.000000e+00> : vector<16x128xf32>
    %18 = tpu.matmul %16, %17, %cst_16 {dimension_numbers = #tpu.dot_dimension_numbers<[1], [0], [0], [1], [0, 0, 1, 1], [], []>} : vector<16x512xbf16>, vector<512x128xbf16>, vector<16x128xf32> -> vector<16x128xf32>
    %c0_17 = arith.constant 0 : index
    %c0_18 = arith.constant 0 : index
    %19 = vector.load %arg7[%c0_17, %c0_18] : memref<1x128xf32, #tpu.memory_space<vmem>>, vector<1x128xf32>
    %20 = vector.broadcast %19 : vector<1x128xf32> to vector<16x128xf32>
    %21 = arith.addf %18, %20 : vector<16x128xf32>
    %c0_19 = arith.constant 0 : index
    %c0_20 = arith.constant 0 : index
    %22 = vector.load %arg9[%c0_19, %c0_20] : memref<16x128xf32, #tpu.memory_space<vmem>>, vector<16x128xf32>
    tpu.vector_store %arg9[%c0_19, %c0_20], %21 {strides = array<i32>} : memref<16x128xf32, #tpu.memory_space<vmem>>, vector<16x128xf32>,
    return
  }
  func.func @transform_0(%arg0: i32) -> (i32, i32) {
    %c0_i32 = arith.constant 0 : i32
    %c0_i32_0 = arith.constant 0 : i32
    return %arg0, %c0_i32 : i32, i32
  }
  func.func @transform_1(%arg0: i32) -> (i32, i32) {
    %c0_i32 = arith.constant 0 : i32
    %c0_i32_0 = arith.constant 0 : i32
    return %arg0, %c0_i32 : i32, i32
  }
  func.func @transform_2(%arg0: i32) -> (i32, i32) {
    %c0_i32 = arith.constant 0 : i32
    %c0_i32_0 = arith.constant 0 : i32
    %c0_i32_1 = arith.constant 0 : i32
    return %c0_i32, %c0_i32_0 : i32, i32
  }
  func.func @transform_3(%arg0: i32) -> (i32, i32) {
    %c0_i32 = arith.constant 0 : i32
    %c0_i32_0 = arith.constant 0 : i32
    %c0_i32_1 = arith.constant 0 : i32
    return %c0_i32, %c0_i32_0 : i32, i32
  }
  func.func @transform_4(%arg0: i32) -> (i32, i32) {
    %c0_i32 = arith.constant 0 : i32
    %c0_i32_0 = arith.constant 0 : i32
    %c0_i32_1 = arith.constant 0 : i32
    return %c0_i32, %c0_i32_0 : i32, i32
  }
  func.func @transform_5(%arg0: i32) -> (i32, i32) {
    %c0_i32 = arith.constant 0 : i32
    %c0_i32_0 = arith.constant 0 : i32
    %c0_i32_1 = arith.constant 0 : i32
    return %c0_i32, %c0_i32_0 : i32, i32
  }
  func.func @transform_6(%arg0: i32) -> (i32, i32) {
    %c0_i32 = arith.constant 0 : i32
    %c0_i32_0 = arith.constant 0 : i32
    %c0_i32_1 = arith.constant 0 : i32
    return %c0_i32, %c0_i32_0 : i32, i32
  }
  func.func @transform_7(%arg0: i32) -> (i32, i32) {
    %c0_i32 = arith.constant 0 : i32
    %c0_i32_0 = arith.constant 0 : i32
    return %arg0, %c0_i32 : i32, i32
  }
  func.func @transform_8(%arg0: i32) -> (i32, i32) {
    %c0_i32 = arith.constant 0 : i32
    %c0_i32_0 = arith.constant 0 : i32
    return %arg0, %c0_i32 : i32, i32
  }
}

</mosaic_0001>

<bundles_post_ra>
// kernel: formant_predictor.1
= control target key start
LH: loop header
LB: loop body
LE: loop exit
PB: predicated region body
PF: predicated region fallthrough
CT: control target
= control target key end

     0   :  { %14 = vsyncpa [#allocation3], 0  ;;  %s3414_s0 = inlined_call_operand.vmem [shape: f32[16,256], index: 0, kind: input, shape index: {}]   ;;  %s3415_s1 = inlined_call_operand.vmem [shape: f32[16,768], index: 1, kind: input, shape index: {}]   ;;  %s3416_s2 = inlined_call_operand.hbm [shape: bf16[256,512], index: 2, kind: input, shape index: {}]   ;;  %s3417_s3 = inlined_call_operand.hbm [shape: bf16[768,512], index: 3, kind: input, shape index: {}]   ;;  %s3418_s4 = inlined_call_operand.vmem [shape: f32[1,512], index: 4, kind: input, shape index: {}]   ;;  %s3419_s5 = inlined_call_operand.hbm [shape: bf16[512,128], index: 5, kind: input, shape index: {}]   ;;  %s3420_s6 = inlined_call_operand.vmem [shape: f32[1,128], index: 6, kind: input, shape index: {}]   ;;  %s3421_s7 = inlined_call_operand.vmem [shape: f32[16,1024], index: 7, kind: output, shape index: {0}]   ;;  %s3422_s8 = inlined_call_operand.vmem [shape: f32[16,128], index: 8, kind: output, shape index: {1}]  }
   0x1   :  { %15 = vsyncpa [#allocation5], 0  ;;  %s3209_s27 = smov [#allocation4]   ;;  %s3210_s29 = smov [#allocation2]  }
   0x2   :  { %s37_s28 = sshll.u32 %s3209_s27, 4  ;;  %s25_s30 = sshll.u32 %s3210_s29, 4  ;;  %s38_s28 = int_to_ptr.vmem [resolvable:$true] %s37_s28  ;;  %s26_s30 = int_to_ptr.vmem [resolvable:$true] %s25_s30 }
   0x3   :  { %s3153_s9 = scalar_lea.vmem %s38_s28, 24576  ;;  %p3158_p1 = scmp.lt.s32.totalorder %s38_s28, %s38_s28 }
   0x4   :  { %p3154_p0 = scmp.ne.s32.totalorder %s38_s28, %s3153_s9  ;;  %p3159_p2 = scmp.lt.s32.totalorder %s3153_s9, %s3153_s9 }
   0x6   :  { %p3160_p3 = por %p3159_p2, %p3158_p1 }
   0x8   :  { %p3161_p4 = pnand %p3160_p3, %p3154_p0 }
   0xa   :  { %3164 = shalt.err (!%p3161_p4)
}
   0xb   :  { %s3211_s10 = smov 256   ;;  %s3212_s11 = smov 16  }
   0xc   :  { %43 = dma.hbm_to_vmem [thread:$0]  %s3417_s3, 24576, %s38_s28, [#allocation5], %s3211_s10, %s3211_s10, %s3212_s11  }
   0xd   :  { %s3173_s14 = scalar_lea.vmem %s26_s30, 8192  ;;  %p3178_p6 = scmp.lt.s32.totalorder %s26_s30, %s26_s30 }
   0xe   :  { %p3174_p5 = scmp.ne.s32.totalorder %s26_s30, %s3173_s14  ;;  %p3179_p7 = scmp.lt.s32.totalorder %s3173_s14, %s3173_s14 }
  0x10   :  { %p3180_p8 = por %p3179_p7, %p3178_p6 }
  0x12   :  { %p3181_p9 = pnand %p3180_p8, %p3174_p5 }
  0x14   :  { %3184 = shalt.err (!%p3181_p9)
}
  0x15   :  { %31 = dma.hbm_to_vmem [thread:$0]  %s3416_s2, 8192, %s26_s30, [#allocation3], %s3211_s10, %s3211_s10, %s3212_s11  }
  0x16   :  { %s3213_s17 = smov [#allocation6]  }
  0x17   :  { %s51_s18 = sshll.u32 %s3213_s17, 4  ;;  %s52_s18 = int_to_ptr.vmem [resolvable:$true] %s51_s18 }
  0x18   :  { %s3193_s19 = scalar_lea.vmem %s52_s18, 4096  ;;  %p3198_p11 = scmp.lt.s32.totalorder %s52_s18, %s52_s18 }
  0x19   :  { %p3194_p10 = scmp.ne.s32.totalorder %s52_s18, %s3193_s19  ;;  %p3199_p12 = scmp.lt.s32.totalorder %s3193_s19, %s3193_s19 }
  0x1b   :  { %p3200_p13 = por %p3199_p12, %p3198_p11 }
  0x1d   :  { %p3201_p0 = pnand %p3200_p13, %p3194_p10 }
  0x1f   :  { %3204 = shalt.err (!%p3201_p0)
}
  0x20   :  { %s3214_s3 = smov 64   ;;  %s3215_s20 = smov 4  }
  0x21   :  { %57 = dma.hbm_to_vmem [thread:$0]  %s3419_s5, 4096, %s52_s18, [#allocation5], %s3214_s3, %s3214_s3, %s3215_s20  }
  0x22   :  { %3205 = dma.done.wait [#allocation3], 8192  }
  0x23   :  { %3206 = vsyncadd [#allocation3], 4294959104 }
  0x24   :  { %3207 = dma.done.wait [#allocation5], 28672  }
  0x25   :  { %3208 = vsyncadd [#allocation5], 4294938624  ;;  %v2729_v0 = vld [vmem:[#allocation4 + $0xe4] ss:$16 sps:$4 sm:$0xff]   ;;  %v2733_v2 = vld [vmem:[#allocation4 + $0xe0] ss:$16 sps:$4 sm:$0xff]  }
  0x26   :  { %v2731_v1 = vld [vmem:[#allocation4 + $0x2e4] ss:$16 sps:$4 sm:$0xff]   ;;  %1326 = vmatprep.subr.bf16.mxu0 %v2729_v0  ;;  %v2734_v3 = vld [vmem:[#allocation4 + $0x2e0] ss:$16 sps:$4 sm:$0xff]   ;;  %v75_v48 = vld [vmem:[%s3415_s1 + $0x8] sm:$0xff] }
  0x27   :  { %1369 = vmatprep.subr.bf16.mxu1 %v2731_v1  ;;  %v2735_v4 = vld [vmem:[#allocation4 + $0xc4] ss:$16 sps:$4 sm:$0xff]   ;;  %1327 = vmatpush1.bf16.msra.mxu0 %v2733_v2  ;;  %v2739_v6 = vld [vmem:[#allocation4 + $0xc0] ss:$16 sps:$4 sm:$0xff]   ;;  %v81_v51 = vld [vmem:[%s3415_s1 + $0x38] sm:$0xff]  ;;  %91 = vst [vmem:[%s3421_s7 + $0x18] sm:$0xff] %v75_v48 }
  0x28   :  { %1370 = vmatpush1.bf16.msra.mxu1 %v2734_v3  ;;  %v2737_v5 = vld [vmem:[#allocation4 + $0x2c4] ss:$16 sps:$4 sm:$0xff]   ;;  %1328 = vmatprep.subr.bf16.mxu0 %v2735_v4  ;;  %v2740_v7 = vld [vmem:[#allocation4 + $0x2c0] ss:$16 sps:$4 sm:$0xff]   ;;  %v77_v52 = vld [vmem:[%s3415_s1 + $0x18] sm:$0xff]  ;;  %97 = vst [vmem:[%s3421_s7 + $0x58] sm:$0xff] %v81_v51  ;;  %v3288_v54 = vpack.c.bf16 %v81_v51, %v75_v48 }
  0x29   :  { %1371 = vmatprep.subr.bf16.mxu1 %v2737_v5  ;;  %v2741_v8 = vld [vmem:[#allocation4 + $0xa4] ss:$16 sps:$4 sm:$0xff]   ;;  %v2745_v10 = vld [vmem:[#allocation4 + $0xa0] ss:$16 sps:$4 sm:$0xff]   ;;  %v83_v53 = vld [vmem:[%s3415_s1 + $0x48] sm:$0xff]  ;;  %93 = vst [vmem:[%s3421_s7 + $0x28] sm:$0xff] %v77_v52 }
  0x2a   :  { %v2743_v9 = vld [vmem:[#allocation4 + $0x2a4] ss:$16 sps:$4 sm:$0xff]   ;;  %v2746_v11 = vld [vmem:[#allocation4 + $0x2a0] ss:$16 sps:$4 sm:$0xff]   ;;  %99 = vst [vmem:[%s3421_s7 + $0x68] sm:$0xff] %v83_v53  ;;  %v3296_v55 = vpack.c.bf16 %v83_v53, %v77_v52  ;;  %1358 = vmatprep.mubr.bf16.mxu0 %v3288_v54 }
  0x2b   :  { %1329 = vmatpush1.bf16.msra.mxu0 %v2739_v6  ;;  %v2747_v12 = vld [vmem:[#allocation4 + $0x84] ss:$16 sps:$4 sm:$0xff]   ;;  %v2751_v14 = vld [vmem:[#allocation4 + $0x80] ss:$16 sps:$4 sm:$0xff]   ;;  %v2870_v48 = vld [vmem:[#allocation4 + $0x8] ss:$16 sps:$4 sm:$0xff]  }
  0x2c   :  { %1372 = vmatpush1.bf16.msra.mxu1 %v2740_v7  ;;  %1330 = vmatprep.subr.bf16.mxu0 %v2741_v8  ;;  %v2749_v13 = vld [vmem:[#allocation4 + $0x284] ss:$16 sps:$4 sm:$0xff]   ;;  %v2752_v15 = vld [vmem:[#allocation4 + $0x280] ss:$16 sps:$4 sm:$0xff]   ;;  %v2876_v52 = vld [vmem:[#allocation4 + $0x1e8] ss:$16 sps:$4 sm:$0xff]  }
  0x2d   :  { %1373 = vmatprep.subr.bf16.mxu1 %v2743_v9  ;;  %v2753_v16 = vld [vmem:[#allocation4 + $0x64] ss:$16 sps:$4 sm:$0xff]   ;;  %v2757_v18 = vld [vmem:[#allocation4 + $0x60] ss:$16 sps:$4 sm:$0xff]   ;;  %1401 = vmatprep.mubr.bf16.mxu1 %v3296_v55 }
  0x2e   :  { %v2755_v17 = vld [vmem:[#allocation4 + $0x264] ss:$16 sps:$4 sm:$0xff]   ;;  %v2758_v19 = vld [vmem:[#allocation4 + $0x260] ss:$16 sps:$4 sm:$0xff]  }
  0x2f   :  { %1331 = vmatpush1.bf16.msra.mxu0 %v2745_v10  ;;  %v2759_v20 = vld [vmem:[#allocation4 + $0x44] ss:$16 sps:$4 sm:$0xff]   ;;  %v2763_v22 = vld [vmem:[#allocation4 + $0x40] ss:$16 sps:$4 sm:$0xff]  }
  0x30   :  { %1374 = vmatpush1.bf16.msra.mxu1 %v2746_v11  ;;  %1332 = vmatprep.subr.bf16.mxu0 %v2747_v12  ;;  %v2761_v21 = vld [vmem:[#allocation4 + $0x244] ss:$16 sps:$4 sm:$0xff]   ;;  %v2764_v23 = vld [vmem:[#allocation4 + $0x240] ss:$16 sps:$4 sm:$0xff]   ;;  %v2830_v11 = vld [vmem:[#allocation4 + $0xec] ss:$16 sps:$4 sm:$0xff]  }
  0x31   :  { %1375 = vmatprep.subr.bf16.mxu1 %v2749_v13  ;;  %v2765_v24 = vld [vmem:[#allocation4 + $0x24] ss:$16 sps:$4 sm:$0xff]   ;;  %v2769_v26 = vld [vmem:[#allocation4 + $0x20] ss:$16 sps:$4 sm:$0xff]  }
  0x32   :  { %v2767_v25 = vld [vmem:[#allocation4 + $0x224] ss:$16 sps:$4 sm:$0xff]   ;;  %v2770_v27 = vld [vmem:[#allocation4 + $0x220] ss:$16 sps:$4 sm:$0xff]  }
  0x33   :  { %1333 = vmatpush1.bf16.msra.mxu0 %v2751_v14  ;;  %v2771_v28 = vld [vmem:[#allocation4 + $0x4] ss:$16 sps:$4 sm:$0xff]   ;;  %v2775_v30 = vld [vmem:[#allocation4] ss:$16 sps:$4 sm:$0xff]  }
  0x34   :  { %1376 = vmatpush1.bf16.msra.mxu1 %v2752_v15  ;;  %1334 = vmatprep.subr.bf16.mxu0 %v2753_v16  ;;  %v2773_v29 = vld [vmem:[#allocation4 + $0x204] ss:$16 sps:$4 sm:$0xff]   ;;  %v2776_v31 = vld [vmem:[#allocation4 + $0x200] ss:$16 sps:$4 sm:$0xff]   ;;  %v2828_v15 = vld [vmem:[#allocation4 + $0xe8] ss:$16 sps:$4 sm:$0xff]  }
  0x35   :  { %1377 = vmatprep.subr.bf16.mxu1 %v2755_v17  ;;  %v2777_v32 = vld [vmem:[#allocation4 + $0x1e4] ss:$16 sps:$4 sm:$0xff]   ;;  %v2781_v34 = vld [vmem:[#allocation4 + $0x1e0] ss:$16 sps:$4 sm:$0xff]   ;;  %v2836_v17 = vld [vmem:[#allocation4 + $0xcc] ss:$16 sps:$4 sm:$0xff]  }
  0x36   :  { %v2779_v33 = vld [vmem:[#allocation4 + $0x3e4] ss:$16 sps:$4 sm:$0xff]   ;;  %v2782_v35 = vld [vmem:[#allocation4 + $0x3e0] ss:$16 sps:$4 sm:$0xff]  }
  0x37   :  { %1335 = vmatpush1.bf16.msra.mxu0 %v2757_v18  ;;  %v2783_v36 = vld [vmem:[#allocation4 + $0x1c4] ss:$16 sps:$4 sm:$0xff]   ;;  %v2787_v38 = vld [vmem:[#allocation4 + $0x1c0] ss:$16 sps:$4 sm:$0xff]  }
  0x38   :  { %1378 = vmatpush1.bf16.msra.mxu1 %v2758_v19  ;;  %1336 = vmatprep.subr.bf16.mxu0 %v2759_v20  ;;  %v2785_v37 = vld [vmem:[#allocation4 + $0x3c4] ss:$16 sps:$4 sm:$0xff]   ;;  %v2788_v39 = vld [vmem:[#allocation4 + $0x3c0] ss:$16 sps:$4 sm:$0xff]   ;;  %v2834_v19 = vld [vmem:[#allocation4 + $0xc8] ss:$16 sps:$4 sm:$0xff]  }
  0x39   :  { %1379 = vmatprep.subr.bf16.mxu1 %v2761_v21  ;;  %v2789_v40 = vld [vmem:[#allocation4 + $0x1a4] ss:$16 sps:$4 sm:$0xff]   ;;  %v2793_v42 = vld [vmem:[#allocation4 + $0x1a0] ss:$16 sps:$4 sm:$0xff]   ;;  %v2842_v21 = vld [vmem:[#allocation4 + $0xac] ss:$16 sps:$4 sm:$0xff]  }
  0x3a   :  { %v2791_v41 = vld [vmem:[#allocation4 + $0x3a4] ss:$16 sps:$4 sm:$0xff]   ;;  %v2794_v43 = vld [vmem:[#allocation4 + $0x3a0] ss:$16 sps:$4 sm:$0xff]  }
  0x3b   :  { %1337 = vmatpush1.bf16.msra.mxu0 %v2763_v22  ;;  %v2795_v44 = vld [vmem:[#allocation4 + $0x184] ss:$16 sps:$4 sm:$0xff]   ;;  %v2799_v46 = vld [vmem:[#allocation4 + $0x180] ss:$16 sps:$4 sm:$0xff]  }
  0x3c   :  { %1380 = vmatpush1.bf16.msra.mxu1 %v2764_v23  ;;  %1338 = vmatprep.subr.bf16.mxu0 %v2765_v24  ;;  %v2797_v45 = vld [vmem:[#allocation4 + $0x384] ss:$16 sps:$4 sm:$0xff]   ;;  %v2800_v47 = vld [vmem:[#allocation4 + $0x380] ss:$16 sps:$4 sm:$0xff]   ;;  %v2840_v23 = vld [vmem:[#allocation4 + $0xa8] ss:$16 sps:$4 sm:$0xff]  }
  0x3d   :  { %1381 = vmatprep.subr.bf16.mxu1 %v2767_v25  ;;  %v2801_v49 = vld [vmem:[#allocation4 + $0x164] ss:$16 sps:$4 sm:$0xff]   ;;  %v2805_v60 = vld [vmem:[#allocation4 + $0x160] ss:$16 sps:$4 sm:$0xff]   ;;  %v2848_v25 = vld [vmem:[#allocation4 + $0x8c] ss:$16 sps:$4 sm:$0xff]  }
  0x3e   :  { %v2803_v50 = vld [vmem:[#allocation4 + $0x364] ss:$16 sps:$4 sm:$0xff]   ;;  %v2806_v61 = vld [vmem:[#allocation4 + $0x360] ss:$16 sps:$4 sm:$0xff]  }
  0x3f   :  { %1339 = vmatpush1.bf16.msra.mxu0 %v2769_v26  ;;  %v74_v56 = vld [vmem:[%s3415_s1] sm:$0xff]  ;;  %v80_v57 = vld [vmem:[%s3415_s1 + $0x30] sm:$0xff] }
  0x40   :  { %1382 = vmatpush1.bf16.msra.mxu1 %v2770_v27  ;;  %1340 = vmatprep.subr.bf16.mxu0 %v2771_v28  ;;  %v76_v58 = vld [vmem:[%s3415_s1 + $0x10] sm:$0xff]  ;;  %90 = vst [vmem:[%s3421_s7 + $0x10] sm:$0xff] %v74_v56  ;;  %96 = vst [vmem:[%s3421_s7 + $0x50] sm:$0xff] %v80_v57  ;;  %v82_v59 = vld [vmem:[%s3415_s1 + $0x40] sm:$0xff]  ;;  %v3324_v12 = vpack.c.bf16 %v80_v57, %v74_v56 }
  0x41   :  { %1383 = vmatprep.subr.bf16.mxu1 %v2773_v29  ;;  %92 = vst [vmem:[%s3421_s7 + $0x20] sm:$0xff] %v76_v58  ;;  %98 = vst [vmem:[%s3421_s7 + $0x60] sm:$0xff] %v82_v59  ;;  %v2807_v62 = vld [vmem:[#allocation4 + $0x144] ss:$16 sps:$4 sm:$0xff]   ;;  %v2811_v0 = vld [vmem:[#allocation4 + $0x140] ss:$16 sps:$4 sm:$0xff]   ;;  %v3326_v13 = vpack.c.bf16 %v82_v59, %v76_v58 }
  0x42   :  { %v2809_v63 = vld [vmem:[#allocation4 + $0x344] ss:$16 sps:$4 sm:$0xff]   ;;  %v2812_v1 = vld [vmem:[#allocation4 + $0x340] ss:$16 sps:$4 sm:$0xff]   ;;  %v2846_v27 = vld [vmem:[#allocation4 + $0x88] ss:$16 sps:$4 sm:$0xff]  }
  0x43   :  { %1341 = vmatpush1.bf16.msra.mxu0 %v2775_v30  ;;  %v2813_v2 = vld [vmem:[#allocation4 + $0x124] ss:$16 sps:$4 sm:$0xff]   ;;  %v2817_v4 = vld [vmem:[#allocation4 + $0x120] ss:$16 sps:$4 sm:$0xff]   ;;  %v2854_v29 = vld [vmem:[#allocation4 + $0x6c] ss:$16 sps:$4 sm:$0xff]  }
  0x44   :  { %1384 = vmatpush1.bf16.msra.mxu1 %v2776_v31  ;;  %1342 = vmatprep.subr.bf16.mxu0 %v2777_v32  ;;  %v2815_v3 = vld [vmem:[#allocation4 + $0x324] ss:$16 sps:$4 sm:$0xff]   ;;  %v2818_v5 = vld [vmem:[#allocation4 + $0x320] ss:$16 sps:$4 sm:$0xff]   ;;  %v2852_v31 = vld [vmem:[#allocation4 + $0x68] ss:$16 sps:$4 sm:$0xff]  }
  0x45   :  { %1385 = vmatprep.subr.bf16.mxu1 %v2779_v33  ;;  %v2819_v6 = vld [vmem:[#allocation4 + $0x104] ss:$16 sps:$4 sm:$0xff]   ;;  %v2823_v8 = vld [vmem:[#allocation4 + $0x100] ss:$16 sps:$4 sm:$0xff]   ;;  %v2860_v33 = vld [vmem:[#allocation4 + $0x4c] ss:$16 sps:$4 sm:$0xff]  }
  0x46   :  { %v2821_v7 = vld [vmem:[#allocation4 + $0x304] ss:$16 sps:$4 sm:$0xff]   ;;  %v2824_v9 = vld [vmem:[#allocation4 + $0x300] ss:$16 sps:$4 sm:$0xff]   ;;  %v2882_v57 = vld [vmem:[#allocation4 + $0x1c8] ss:$16 sps:$4 sm:$0xff]  }
  0x47   :  { %1343 = vmatpush2.bf16.msra.mxu0 %v2781_v34  ;;  %v2827_v10 = vld [vmem:[#allocation4 + $0x4e4] ss:$16 sps:$4 sm:$0xff]   ;;  %v2825_v14 = vld [vmem:[#allocation4 + $0x4e0] ss:$16 sps:$4 sm:$0xff]   ;;  %v2890_v59 = vld [vmem:[#allocation4 + $0x1ac] ss:$16 sps:$4 sm:$0xff]  }
  0x48   :  { %1386 = vmatpush2.bf16.msra.mxu1 %v2782_v35  ;;  %1344 = vmatprep.subr.bf16.mxu0 %v2783_v36  ;;  %v2833_v16 = vld [vmem:[#allocation4 + $0x4c4] ss:$16 sps:$4 sm:$0xff]   ;;  %v2831_v18 = vld [vmem:[#allocation4 + $0x4c0] ss:$16 sps:$4 sm:$0xff]   ;;  %v2858_v35 = vld [vmem:[#allocation4 + $0x48] ss:$16 sps:$4 sm:$0xff]  }
  0x49   :  { %1387 = vmatprep.subr.bf16.mxu1 %v2785_v37  ;;  %v2839_v20 = vld [vmem:[#allocation4 + $0x4a4] ss:$16 sps:$4 sm:$0xff]   ;;  %v2837_v22 = vld [vmem:[#allocation4 + $0x4a0] ss:$16 sps:$4 sm:$0xff]   ;;  %v2866_v37 = vld [vmem:[#allocation4 + $0x2c] ss:$16 sps:$4 sm:$0xff]  }
  0x4a   :  { %v2845_v24 = vld [vmem:[#allocation4 + $0x484] ss:$16 sps:$4 sm:$0xff]   ;;  %v2843_v26 = vld [vmem:[#allocation4 + $0x480] ss:$16 sps:$4 sm:$0xff]  }
  0x4b   :  { %1345 = vmatpush2.bf16.msra.mxu0 %v2787_v38  ;;  %v2851_v28 = vld [vmem:[#allocation4 + $0x464] ss:$16 sps:$4 sm:$0xff]   ;;  %v2849_v30 = vld [vmem:[#allocation4 + $0x460] ss:$16 sps:$4 sm:$0xff]  }
  0x4c   :  { %1388 = vmatpush2.bf16.msra.mxu1 %v2788_v39  ;;  %1346 = vmatprep.subr.bf16.mxu0 %v2789_v40  ;;  %v2857_v32 = vld [vmem:[#allocation4 + $0x444] ss:$16 sps:$4 sm:$0xff]   ;;  %v2855_v34 = vld [vmem:[#allocation4 + $0x440] ss:$16 sps:$4 sm:$0xff]   ;;  %v2864_v39 = vld [vmem:[#allocation4 + $0x28] ss:$16 sps:$4 sm:$0xff]  }
  0x4d   :  { %1389 = vmatprep.subr.bf16.mxu1 %v2791_v41  ;;  %v2863_v36 = vld [vmem:[#allocation4 + $0x424] ss:$16 sps:$4 sm:$0xff]   ;;  %v2861_v38 = vld [vmem:[#allocation4 + $0x420] ss:$16 sps:$4 sm:$0xff]   ;;  %v2872_v41 = vld [vmem:[#allocation4 + $0xc] ss:$16 sps:$4 sm:$0xff]  }
  0x4e   :  { %v2869_v40 = vld [vmem:[#allocation4 + $0x404] ss:$16 sps:$4 sm:$0xff]   ;;  %v2873_v51 = vld [vmem:[#allocation4 + $0x5e0] ss:$16 sps:$4 sm:$0xff]  }
  0x4f   :  { %1347 = vmatpush2.bf16.msra.mxu0 %v2793_v42  ;;  %v79_v42 = vld [vmem:[%s3415_s1 + $0x28] sm:$0xff]  ;;  %v2881_v53 = vld [vmem:[#allocation4 + $0x5c4] ss:$16 sps:$4 sm:$0xff]   ;;  %v2879_v56 = vld [vmem:[#allocation4 + $0x5c0] ss:$16 sps:$4 sm:$0xff]  }
  0x50   :  { %1390 = vmatpush2.bf16.msra.mxu1 %v2794_v43  ;;  %1348 = vmatprep.subr.bf16.mxu0 %v2795_v44  ;;  %v85_v43 = vld [vmem:[%s3415_s1 + $0x58] sm:$0xff]  ;;  %v3340_v44 = vld [vmem:[%s3415_s1 + $0x20] sm:$0xff]  ;;  %95 = vst [vmem:[%s3421_s7 + $0x38] sm:$0xff] %v79_v42 }
  0x51   :  { %1391 = vmatprep.subr.bf16.mxu1 %v2797_v45  ;;  %101 = vst [vmem:[%s3421_s7 + $0x78] sm:$0xff] %v85_v43  ;;  %v3348_v45 = vpack.c.bf16 %v85_v43, %v79_v42  ;;  %94 = vst [vmem:[%s3421_s7 + $0x30] sm:$0xff] %v3340_v44  ;;  %v2887_v58 = vld [vmem:[#allocation4 + $0x5a4] ss:$16 sps:$4 sm:$0xff]   ;;  %v2954_v42 = vld [vmem:[#allocation4 + $0x448] ss:$16 sps:$4 sm:$0xff]  }
  0x52   :  { %v2959_v43 = vld [vmem:[#allocation4 + $0x22c] ss:$16 sps:$4 sm:$0xff]  }
  0x53   :  { %1349 = vmatpush2.bf16.msra.mxu0 %v2799_v46  ;;  %v3353_v46 = vld [vmem:[%s3415_s1 + $0x50] sm:$0xff] }
  0x54   :  { %1392 = vmatpush2.bf16.msra.mxu1 %v2800_v47  ;;  %1350 = vmatprep.subr.bf16.mxu0 %v2801_v49  ;;  %100 = vst [vmem:[%s3421_s7 + $0x70] sm:$0xff] %v3353_v46  ;;  %v2867_v47 = vld [vmem:[#allocation4 + $0x400] ss:$16 sps:$4 sm:$0xff]   ;;  %v2875_v49 = vld [vmem:[#allocation4 + $0x5e4] ss:$16 sps:$4 sm:$0xff]  }
  0x55   :  { %1393 = vmatprep.subr.bf16.mxu1 %v2803_v50  ;;  %v2878_v50 = vld [vmem:[#allocation4 + $0x1ec] ss:$16 sps:$4 sm:$0xff]  }
  0x57   :  { %1351 = vmatpush2.bf16.msra.mxu0 %v2805_v60  ;;  %v2885_v60 = vld [vmem:[#allocation4 + $0x5a0] ss:$16 sps:$4 sm:$0xff]  }
  0x58   :  { %1394 = vmatpush2.bf16.msra.mxu1 %v2806_v61  ;;  %1352 = vmatprep.subr.bf16.mxu0 %v2807_v62  ;;  %v2888_v61 = vld [vmem:[#allocation4 + $0x1a8] ss:$16 sps:$4 sm:$0xff]   ;;  %v2893_v62 = vld [vmem:[#allocation4 + $0x584] ss:$16 sps:$4 sm:$0xff]  }
  0x59   :  { %1395 = vmatprep.subr.bf16.mxu1 %v2809_v63  ;;  %v2896_v63 = vld [vmem:[#allocation4 + $0x18c] ss:$16 sps:$4 sm:$0xff]  }
  0x5b   :  { %1353 = vmatpush2.bf16.msra.mxu0 %v2811_v0  ;;  %v2891_v0 = vld [vmem:[#allocation4 + $0x580] ss:$16 sps:$4 sm:$0xff]  }
  0x5c   :  { %1396 = vmatpush2.bf16.msra.mxu1 %v2812_v1  ;;  %1354 = vmatprep.subr.bf16.mxu0 %v2813_v2  ;;  %v2894_v1 = vld [vmem:[#allocation4 + $0x188] ss:$16 sps:$4 sm:$0xff]   ;;  %v2899_v2 = vld [vmem:[#allocation4 + $0x564] ss:$16 sps:$4 sm:$0xff]  }
  0x5d   :  { %1397 = vmatprep.subr.bf16.mxu1 %v2815_v3  ;;  %v2902_v3 = vld [vmem:[#allocation4 + $0x16c] ss:$16 sps:$4 sm:$0xff]  }
  0x5f   :  { %1355 = vmatpush2.bf16.msra.mxu0 %v2817_v4  ;;  %v2897_v4 = vld [vmem:[#allocation4 + $0x560] ss:$16 sps:$4 sm:$0xff]  }
  0x60   :  { %1398 = vmatpush2.bf16.msra.mxu1 %v2818_v5  ;;  %1356 = vmatprep.subr.bf16.mxu0 %v2819_v6  ;;  %v2900_v5 = vld [vmem:[#allocation4 + $0x168] ss:$16 sps:$4 sm:$0xff]   ;;  %v2905_v6 = vld [vmem:[#allocation4 + $0x544] ss:$16 sps:$4 sm:$0xff]  }
  0x61   :  { %1399 = vmatprep.subr.bf16.mxu1 %v2821_v7  ;;  %v2908_v7 = vld [vmem:[#allocation4 + $0x14c] ss:$16 sps:$4 sm:$0xff]  }
  0x63   :  { %1357 = vmatpush2.bf16.msra.mxu0 %v2823_v8  ;;  %v2903_v8 = vld [vmem:[#allocation4 + $0x540] ss:$16 sps:$4 sm:$0xff]  }
  0x64   :  { %1400 = vmatpush2.bf16.msra.mxu1 %v2824_v9  ;;  %1412 = vmatprep.subr.bf16.mxu0 %v2827_v10  ;;  %v2906_v9 = vld [vmem:[#allocation4 + $0x148] ss:$16 sps:$4 sm:$0xff]   ;;  %v2911_v10 = vld [vmem:[#allocation4 + $0x524] ss:$16 sps:$4 sm:$0xff]  }
  0x65   :  { %1455 = vmatprep.subr.bf16.mxu1 %v2830_v11  ;;  %v2914_v11 = vld [vmem:[#allocation4 + $0x12c] ss:$16 sps:$4 sm:$0xff]  }
  0x66   :  { %1359 = vmatmul.mubr.bf16.vlgmr.msra.gmra.mxu0 %v3324_v12 }
  0x67   :  { %1402 = vmatmul.mubr.bf16.vlgmr.msra.gmra.mxu1 %v3326_v13  ;;  %1413 = vmatpush1.bf16.msra.mxu0 %v2825_v14  ;;  %v2909_v14 = vld [vmem:[#allocation4 + $0x520] ss:$16 sps:$4 sm:$0xff]  }
  0x68   :  { %1456 = vmatpush1.bf16.msra.mxu1 %v2828_v15  ;;  %1414 = vmatprep.subr.bf16.mxu0 %v2833_v16  ;;  %v2912_v15 = vld [vmem:[#allocation4 + $0x128] ss:$16 sps:$4 sm:$0xff]   ;;  %v2917_v16 = vld [vmem:[#allocation4 + $0x504] ss:$16 sps:$4 sm:$0xff]  }
  0x69   :  { %1457 = vmatprep.subr.bf16.mxu1 %v2836_v17  ;;  %1487 = vmatprep.mubr.bf16.mxu1 %v3288_v54  ;;  %v2884_v54 = vld [vmem:[#allocation4 + $0x1cc] ss:$16 sps:$4 sm:$0xff]  }
  0x6a   :  { %1444 = vmatprep.mubr.bf16.mxu0 %v3348_v45  ;;  %v2920_v17 = vld [vmem:[#allocation4 + $0x10c] ss:$16 sps:$4 sm:$0xff]  }
  0x6b   :  { %1415 = vmatpush1.bf16.msra.mxu0 %v2831_v18  ;;  %v2915_v18 = vld [vmem:[#allocation4 + $0x500] ss:$16 sps:$4 sm:$0xff]  }
  0x6c   :  { %1458 = vmatpush1.bf16.msra.mxu1 %v2834_v19  ;;  %1416 = vmatprep.subr.bf16.mxu0 %v2839_v20  ;;  %v2918_v19 = vld [vmem:[#allocation4 + $0x108] ss:$16 sps:$4 sm:$0xff]   ;;  %v2923_v20 = vld [vmem:[#allocation4 + $0x2ec] ss:$16 sps:$4 sm:$0xff]  }
  0x6d   :  { %1459 = vmatprep.subr.bf16.mxu1 %v2842_v21  ;;  %v2926_v21 = vld [vmem:[#allocation4 + $0x4ec] ss:$16 sps:$4 sm:$0xff]  }
  0x6f   :  { %1417 = vmatpush1.bf16.msra.mxu0 %v2837_v22  ;;  %v3366_v22 = vpack.c.bf16 %v3353_v46, %v3340_v44  ;;  %v2962_v44 = vld [vmem:[#allocation4 + $0x42c] ss:$16 sps:$4 sm:$0xff]   ;;  %v2960_v46 = vld [vmem:[#allocation4 + $0x428] ss:$16 sps:$4 sm:$0xff]  }
  0x70   :  { %1460 = vmatpush1.bf16.msra.mxu1 %v2840_v23  ;;  %1418 = vmatprep.subr.bf16.mxu0 %v2845_v24  ;;  %v2921_v23 = vld [vmem:[#allocation4 + $0x2e8] ss:$16 sps:$4 sm:$0xff]  }
  0x71   :  { %1461 = vmatprep.subr.bf16.mxu1 %v2848_v25  ;;  %v2924_v24 = vld [vmem:[#allocation4 + $0x4e8] ss:$16 sps:$4 sm:$0xff]   ;;  %v2929_v25 = vld [vmem:[#allocation4 + $0x2cc] ss:$16 sps:$4 sm:$0xff]  }
  0x73   :  { %1419 = vmatpush1.bf16.msra.mxu0 %v2843_v26  ;;  %v2932_v26 = vld [vmem:[#allocation4 + $0x4cc] ss:$16 sps:$4 sm:$0xff]  }
  0x74   :  { %1462 = vmatpush1.bf16.msra.mxu1 %v2846_v27  ;;  %1420 = vmatprep.subr.bf16.mxu0 %v2851_v28  ;;  %v2927_v27 = vld [vmem:[#allocation4 + $0x2c8] ss:$16 sps:$4 sm:$0xff]  }
  0x75   :  { %1463 = vmatprep.subr.bf16.mxu1 %v2854_v29  ;;  %v2930_v28 = vld [vmem:[#allocation4 + $0x4c8] ss:$16 sps:$4 sm:$0xff]   ;;  %v2935_v29 = vld [vmem:[#allocation4 + $0x2ac] ss:$16 sps:$4 sm:$0xff]  }
  0x77   :  { %1421 = vmatpush1.bf16.msra.mxu0 %v2849_v30  ;;  %v2938_v30 = vld [vmem:[#allocation4 + $0x4ac] ss:$16 sps:$4 sm:$0xff]  }
  0x78   :  { %1464 = vmatpush1.bf16.msra.mxu1 %v2852_v31  ;;  %1422 = vmatprep.subr.bf16.mxu0 %v2857_v32  ;;  %v2933_v31 = vld [vmem:[#allocation4 + $0x2a8] ss:$16 sps:$4 sm:$0xff]  }
  0x79   :  { %1465 = vmatprep.subr.bf16.mxu1 %v2860_v33  ;;  %v2936_v32 = vld [vmem:[#allocation4 + $0x4a8] ss:$16 sps:$4 sm:$0xff]   ;;  %v2941_v33 = vld [vmem:[#allocation4 + $0x28c] ss:$16 sps:$4 sm:$0xff]  }
  0x7b   :  { %1423 = vmatpush1.bf16.msra.mxu0 %v2855_v34  ;;  %v2939_v34 = vld [vmem:[#allocation4 + $0x288] ss:$16 sps:$4 sm:$0xff]  }
  0x7c   :  { %1466 = vmatpush1.bf16.msra.mxu1 %v2858_v35  ;;  %1424 = vmatprep.subr.bf16.mxu0 %v2863_v36  ;;  %v2942_v35 = vld [vmem:[#allocation4 + $0x488] ss:$16 sps:$4 sm:$0xff]   ;;  %v2947_v36 = vld [vmem:[#allocation4 + $0x26c] ss:$16 sps:$4 sm:$0xff]  }
  0x7d   :  { %1467 = vmatprep.subr.bf16.mxu1 %v2866_v37  ;;  %v2950_v37 = vld [vmem:[#allocation4 + $0x46c] ss:$16 sps:$4 sm:$0xff]  }
  0x7f   :  { %1425 = vmatpush1.bf16.msra.mxu0 %v2861_v38  ;;  %v2945_v38 = vld [vmem:[#allocation4 + $0x268] ss:$16 sps:$4 sm:$0xff]  }
  0x80   :  { %1468 = vmatpush1.bf16.msra.mxu1 %v2864_v39  ;;  %1426 = vmatprep.subr.bf16.mxu0 %v2869_v40  ;;  %v2953_v39 = vld [vmem:[#allocation4 + $0x24c] ss:$16 sps:$4 sm:$0xff]  }
  0x81   :  { %1469 = vmatprep.subr.bf16.mxu1 %v2872_v41  ;;  %v2956_v40 = vld [vmem:[#allocation4 + $0x44c] ss:$16 sps:$4 sm:$0xff]   ;;  %v2951_v41 = vld [vmem:[#allocation4 + $0x248] ss:$16 sps:$4 sm:$0xff]  }
  0x83   :  { %1427 = vmatpush1.bf16.msra.mxu0 %v2867_v47  ;;  %v2965_v47 = vld [vmem:[#allocation4 + $0x20c] ss:$16 sps:$4 sm:$0xff]  }
  0x84   :  { %1470 = vmatpush1.bf16.msra.mxu1 %v2870_v48  ;;  %1428 = vmatprep.subr.bf16.mxu0 %v2875_v49  ;;  %v2968_v48 = vld [vmem:[#allocation4 + $0x40c] ss:$16 sps:$4 sm:$0xff]   ;;  %v2963_v49 = vld [vmem:[#allocation4 + $0x208] ss:$16 sps:$4 sm:$0xff]  }
  0x85   :  { %1471 = vmatprep.subr.bf16.mxu1 %v2878_v50  ;;  %v2966_v50 = vld [vmem:[#allocation4 + $0x408] ss:$16 sps:$4 sm:$0xff]  }
  0x87   :  { %1429 = vmatpush2.bf16.msra.mxu0 %v2873_v51  ;;  %v2971_v51 = vld [vmem:[#allocation4 + $0x3ec] ss:$16 sps:$4 sm:$0xff]  }
  0x88   :  { %1472 = vmatpush2.bf16.msra.mxu1 %v2876_v52  ;;  %1430 = vmatprep.subr.bf16.mxu0 %v2881_v53  ;;  %v2974_v52 = vld [vmem:[#allocation4 + $0x5ec] ss:$16 sps:$4 sm:$0xff]   ;;  %v2969_v53 = vld [vmem:[#allocation4 + $0x3e8] ss:$16 sps:$4 sm:$0xff]  }
  0x89   :  { %1473 = vmatprep.subr.bf16.mxu1 %v2884_v54  ;;  %v2972_v54 = vld [vmem:[#allocation4 + $0x5e8] ss:$16 sps:$4 sm:$0xff]  }
  0x8b   :  { %1431 = vmatpush2.bf16.msra.mxu0 %v2879_v56  ;;  %v2977_v56 = vld [vmem:[#allocation4 + $0x3cc] ss:$16 sps:$4 sm:$0xff]  }
  0x8c   :  { %1474 = vmatpush2.bf16.msra.mxu1 %v2882_v57  ;;  %1432 = vmatprep.subr.bf16.mxu0 %v2887_v58  ;;  %v2980_v57 = vld [vmem:[#allocation4 + $0x5cc] ss:$16 sps:$4 sm:$0xff]   ;;  %v2975_v58 = vld [vmem:[#allocation4 + $0x3c8] ss:$16 sps:$4 sm:$0xff]  }
  0x8d   :  { %1475 = vmatprep.subr.bf16.mxu1 %v2890_v59  ;;  %v2978_v59 = vld [vmem:[#allocation4 + $0x5c8] ss:$16 sps:$4 sm:$0xff]  }
  0x8f   :  { %1433 = vmatpush2.bf16.msra.mxu0 %v2885_v60  ;;  %v2983_v60 = vld [vmem:[#allocation4 + $0x3ac] ss:$16 sps:$4 sm:$0xff]  }
  0x90   :  { %1476 = vmatpush2.bf16.msra.mxu1 %v2888_v61  ;;  %1434 = vmatprep.subr.bf16.mxu0 %v2893_v62  ;;  %v2986_v61 = vld [vmem:[#allocation4 + $0x5ac] ss:$16 sps:$4 sm:$0xff]   ;;  %v2981_v62 = vld [vmem:[#allocation4 + $0x3a8] ss:$16 sps:$4 sm:$0xff]  }
  0x91   :  { %1477 = vmatprep.subr.bf16.mxu1 %v2896_v63  ;;  %v2984_v63 = vld [vmem:[#allocation4 + $0x5a8] ss:$16 sps:$4 sm:$0xff]  }
  0x93   :  { %1435 = vmatpush2.bf16.msra.mxu0 %v2891_v0  ;;  %v2989_v0 = vld [vmem:[#allocation4 + $0x38c] ss:$16 sps:$4 sm:$0xff]  }
  0x94   :  { %1478 = vmatpush2.bf16.msra.mxu1 %v2894_v1  ;;  %1436 = vmatprep.subr.bf16.mxu0 %v2899_v2  ;;  %v2992_v1 = vld [vmem:[#allocation4 + $0x58c] ss:$16 sps:$4 sm:$0xff]   ;;  %v2987_v2 = vld [vmem:[#allocation4 + $0x388] ss:$16 sps:$4 sm:$0xff]  }
  0x95   :  { %1479 = vmatprep.subr.bf16.mxu1 %v2902_v3  ;;  %v2990_v3 = vld [vmem:[#allocation4 + $0x588] ss:$16 sps:$4 sm:$0xff]  }
  0x97   :  { %1437 = vmatpush2.bf16.msra.mxu0 %v2897_v4  ;;  %v2995_v4 = vld [vmem:[#allocation4 + $0x36c] ss:$16 sps:$4 sm:$0xff]  }
  0x98   :  { %1480 = vmatpush2.bf16.msra.mxu1 %v2900_v5  ;;  %1438 = vmatprep.subr.bf16.mxu0 %v2905_v6  ;;  %v2998_v5 = vld [vmem:[#allocation4 + $0x56c] ss:$16 sps:$4 sm:$0xff]   ;;  %v2993_v6 = vld [vmem:[#allocation4 + $0x368] ss:$16 sps:$4 sm:$0xff]  }
  0x99   :  { %1481 = vmatprep.subr.bf16.mxu1 %v2908_v7  ;;  %v2996_v7 = vld [vmem:[#allocation4 + $0x568] ss:$16 sps:$4 sm:$0xff]  }
  0x9b   :  { %1439 = vmatpush2.bf16.msra.mxu0 %v2903_v8  ;;  %v71_v8 = vld [vmem:[%s3414_s0 + $0x8] sm:$0xff] }
  0x9c   :  { %1482 = vmatpush2.bf16.msra.mxu1 %v2906_v9  ;;  %1440 = vmatprep.subr.bf16.mxu0 %v2911_v10  ;;  %v3001_v9 = vld [vmem:[#allocation4 + $0x34c] ss:$16 sps:$4 sm:$0xff]   ;;  %87 = vst [vmem:[%s3421_s7 + $0x8] sm:$0xff] %v71_v8 }
  0x9d   :  { %1483 = vmatprep.subr.bf16.mxu1 %v2914_v11  ;;  %v3004_v10 = vld [vmem:[#allocation4 + $0x54c] ss:$16 sps:$4 sm:$0xff]  }
  0x9e   :  { %v73_v11 = vld [vmem:[%s3414_s0 + $0x18] sm:$0xff] }
  0x9f   :  { %1441 = vmatpush2.bf16.msra.mxu0 %v2909_v14  ;;  %v70_v14 = vld [vmem:[%s3414_s0] sm:$0xff]  ;;  %89 = vst [vmem:[%s3421_s7 + $0x48] sm:$0xff] %v73_v11 }
  0xa0   :  { %1484 = vmatpush2.bf16.msra.mxu1 %v2912_v15  ;;  %1442 = vmatprep.subr.bf16.mxu0 %v2917_v16  ;;  %v72_v15 = vld [vmem:[%s3414_s0 + $0x10] sm:$0xff]  ;;  %86 = vst [vmem:[%s3421_s7] sm:$0xff] %v70_v14 }
  0xa1   :  { %1485 = vmatprep.subr.bf16.mxu1 %v2920_v17  ;;  %88 = vst [vmem:[%s3421_s7 + $0x40] sm:$0xff] %v72_v15  ;;  %v3396_v16 = vpack.c.bf16 %v72_v15, %v70_v14  ;;  %v2999_v17 = vld [vmem:[#allocation4 + $0x348] ss:$16 sps:$4 sm:$0xff]   ;;  %v3089_v14 = vld [vmem:[#allocation2 + $0x160] ss:$16 sps:$4 sm:$0xff]  }
  0xa2   :  { %v3092_v15 = vld [vmem:[#allocation2 + $0x168] ss:$16 sps:$4 sm:$0xff]  }
  0xa3   :  { %1443 = vmatpush2.bf16.msra.mxu0 %v2915_v18  ;;  %v3002_v18 = vld [vmem:[#allocation4 + $0x548] ss:$16 sps:$4 sm:$0xff]  }
  0xa4   :  { %1486 = vmatpush2.bf16.msra.mxu1 %v2918_v19  ;;  %1498 = vmatprep.subr.bf16.mxu0 %v2923_v20  ;;  %v3007_v19 = vld [vmem:[#allocation4 + $0x32c] ss:$16 sps:$4 sm:$0xff]  }
  0xa5   :  { %1541 = vmatprep.subr.bf16.mxu1 %v2926_v21  ;;  %v3010_v20 = vld [vmem:[#allocation4 + $0x52c] ss:$16 sps:$4 sm:$0xff]   ;;  %v3005_v21 = vld [vmem:[#allocation4 + $0x328] ss:$16 sps:$4 sm:$0xff]  }
  0xa6   :  { %1445 = vmatmul.mubr.bf16.vlgmr.msra.gmra.mxu0 %v3366_v22 }
  0xa7   :  { %1488 = vmatmul.mubr.bf16.vlgmr.msra.gmra.mxu1 %v3324_v12  ;;  %1499 = vmatpush1.bf16.msra.mxu0 %v2921_v23  ;;  %v2944_v12 = vld [vmem:[#allocation4 + $0x48c] ss:$16 sps:$4 sm:$0xff]   ;;  %v3008_v23 = vld [vmem:[#allocation4 + $0x528] ss:$16 sps:$4 sm:$0xff]  }
  0xa8   :  { %1542 = vmatpush1.bf16.msra.mxu1 %v2924_v24  ;;  %1500 = vmatprep.subr.bf16.mxu0 %v2929_v25  ;;  %v3013_v24 = vld [vmem:[#allocation4 + $0x30c] ss:$16 sps:$4 sm:$0xff]  }
  0xa9   :  { %1543 = vmatprep.subr.bf16.mxu1 %v2932_v26  ;;  %1530 = vmatprep.mubr.bf16.mxu0 %v3296_v55  ;;  %v2948_v55 = vld [vmem:[#allocation4 + $0x468] ss:$16 sps:$4 sm:$0xff]   ;;  %v3016_v25 = vld [vmem:[#allocation4 + $0x50c] ss:$16 sps:$4 sm:$0xff]  }
  0xaa   :  { %1573 = vmatprep.mubr.bf16.mxu1 %v3348_v45  ;;  %v2957_v45 = vld [vmem:[#allocation4 + $0x228] ss:$16 sps:$4 sm:$0xff]  }
  0xab   :  { %1501 = vmatpush1.bf16.msra.mxu0 %v2927_v27  ;;  %v3011_v26 = vld [vmem:[#allocation4 + $0x308] ss:$16 sps:$4 sm:$0xff]  }
  0xac   :  { %1544 = vmatpush1.bf16.msra.mxu1 %v2930_v28  ;;  %1502 = vmatprep.subr.bf16.mxu0 %v2935_v29  ;;  %v3014_v27 = vld [vmem:[#allocation4 + $0x508] ss:$16 sps:$4 sm:$0xff]   ;;  %v3019_v28 = vld [vmem:[#allocation2 + $0xe4] ss:$16 sps:$4 sm:$0xff]   ;;  %v3022_v29 = vld [vmem:[#allocation2 + $0xec] ss:$16 sps:$4 sm:$0xff]  }
  0xad   :  { %1545 = vmatprep.subr.bf16.mxu1 %v2938_v30  ;;  %v3017_v30 = vld [vmem:[#allocation2 + $0xe0] ss:$16 sps:$4 sm:$0xff]  }
  0xaf   :  { %1503 = vmatpush1.bf16.msra.mxu0 %v2933_v31  ;;  %v3020_v31 = vld [vmem:[#allocation2 + $0xe8] ss:$16 sps:$4 sm:$0xff]  }
  0xb0   :  { %1546 = vmatpush1.bf16.msra.mxu1 %v2936_v32  ;;  %1504 = vmatprep.subr.bf16.mxu0 %v2941_v33  ;;  %v3025_v32 = vld [vmem:[#allocation2 + $0xc4] ss:$16 sps:$4 sm:$0xff]   ;;  %v3028_v33 = vld [vmem:[#allocation2 + $0xcc] ss:$16 sps:$4 sm:$0xff]  }
  0xb1   :  { %1547 = vmatprep.subr.bf16.mxu1 %v2944_v12  ;;  %v3023_v12 = vld [vmem:[#allocation2 + $0xc0] ss:$16 sps:$4 sm:$0xff]  }
  0xb3   :  { %1505 = vmatpush1.bf16.msra.mxu0 %v2939_v34  ;;  %v3026_v34 = vld [vmem:[#allocation2 + $0xc8] ss:$16 sps:$4 sm:$0xff]  }
  0xb4   :  { %1548 = vmatpush1.bf16.msra.mxu1 %v2942_v35  ;;  %1506 = vmatprep.subr.bf16.mxu0 %v2947_v36  ;;  %v103_v35 = vpack.c.bf16 %v73_v11, %v71_v8  ;;  %v3031_v36 = vld [vmem:[#allocation2 + $0xa4] ss:$16 sps:$4 sm:$0xff]   ;;  %v3083_v8 = vld [vmem:[#allocation2 + $0x180] ss:$16 sps:$4 sm:$0xff]   ;;  %v3094_v11 = vld [vmem:[#allocation2 + $0x16c] ss:$16 sps:$4 sm:$0xff]  }
  0xb5   :  { %1549 = vmatprep.subr.bf16.mxu1 %v2950_v37  ;;  %v3034_v37 = vld [vmem:[#allocation2 + $0xac] ss:$16 sps:$4 sm:$0xff]  }
  0xb7   :  { %1507 = vmatpush1.bf16.msra.mxu0 %v2945_v38  ;;  %v3029_v38 = vld [vmem:[#allocation2 + $0xa0] ss:$16 sps:$4 sm:$0xff]  }
  0xb8   :  { %1550 = vmatpush1.bf16.msra.mxu1 %v2948_v55  ;;  %1508 = vmatprep.subr.bf16.mxu0 %v2953_v39  ;;  %v3032_v55 = vld [vmem:[#allocation2 + $0xa8] ss:$16 sps:$4 sm:$0xff]   ;;  %v3037_v39 = vld [vmem:[#allocation2 + $0x84] ss:$16 sps:$4 sm:$0xff]  }
  0xb9   :  { %1551 = vmatprep.subr.bf16.mxu1 %v2956_v40  ;;  %v3040_v40 = vld [vmem:[#allocation2 + $0x8c] ss:$16 sps:$4 sm:$0xff]  }
  0xbb   :  { %1509 = vmatpush1.bf16.msra.mxu0 %v2951_v41  ;;  %v3043_v41 = vld [vmem:[#allocation2 + $0x64] ss:$16 sps:$4 sm:$0xff]  }
  0xbc   :  { %1552 = vmatpush1.bf16.msra.mxu1 %v2954_v42  ;;  %1510 = vmatprep.subr.bf16.mxu0 %v2959_v43  ;;  %v3046_v42 = vld [vmem:[#allocation2 + $0x6c] ss:$16 sps:$4 sm:$0xff]   ;;  %v3041_v43 = vld [vmem:[#allocation2 + $0x60] ss:$16 sps:$4 sm:$0xff]  }
  0xbd   :  { %1553 = vmatprep.subr.bf16.mxu1 %v2962_v44  ;;  %v3044_v44 = vld [vmem:[#allocation2 + $0x68] ss:$16 sps:$4 sm:$0xff]  }
  0xbf   :  { %1511 = vmatpush1.bf16.msra.mxu0 %v2957_v45  ;;  %v3049_v45 = vld [vmem:[#allocation2 + $0x44] ss:$16 sps:$4 sm:$0xff]  }
  0xc0   :  { %1554 = vmatpush1.bf16.msra.mxu1 %v2960_v46  ;;  %1512 = vmatprep.subr.bf16.mxu0 %v2965_v47  ;;  %v3052_v46 = vld [vmem:[#allocation2 + $0x4c] ss:$16 sps:$4 sm:$0xff]   ;;  %v3047_v47 = vld [vmem:[#allocation2 + $0x40] ss:$16 sps:$4 sm:$0xff]  }
  0xc1   :  { %1555 = vmatprep.subr.bf16.mxu1 %v2968_v48  ;;  %v3050_v48 = vld [vmem:[#allocation2 + $0x48] ss:$16 sps:$4 sm:$0xff]  }
  0xc3   :  { %1513 = vmatpush1.bf16.msra.mxu0 %v2963_v49  ;;  %v3055_v49 = vld [vmem:[#allocation2 + $0x24] ss:$16 sps:$4 sm:$0xff]  }
  0xc4   :  { %1556 = vmatpush1.bf16.msra.mxu1 %v2966_v50  ;;  %1514 = vmatprep.subr.bf16.mxu0 %v2971_v51  ;;  %v3058_v50 = vld [vmem:[#allocation2 + $0x2c] ss:$16 sps:$4 sm:$0xff]   ;;  %v3053_v51 = vld [vmem:[#allocation2 + $0x20] ss:$16 sps:$4 sm:$0xff]  }
  0xc5   :  { %1557 = vmatprep.subr.bf16.mxu1 %v2974_v52  ;;  %v3056_v52 = vld [vmem:[#allocation2 + $0x28] ss:$16 sps:$4 sm:$0xff]  }
  0xc7   :  { %1515 = vmatpush2.bf16.msra.mxu0 %v2969_v53  ;;  %v3061_v53 = vld [vmem:[#allocation2 + $0x4] ss:$16 sps:$4 sm:$0xff]  }
  0xc8   :  { %1558 = vmatpush2.bf16.msra.mxu1 %v2972_v54  ;;  %1516 = vmatprep.subr.bf16.mxu0 %v2977_v56  ;;  %v3064_v54 = vld [vmem:[#allocation2 + $0xc] ss:$16 sps:$4 sm:$0xff]   ;;  %v3059_v56 = vld [vmem:[#allocation2] ss:$16 sps:$4 sm:$0xff]  }
  0xc9   :  { %1559 = vmatprep.subr.bf16.mxu1 %v2980_v57  ;;  %v3062_v57 = vld [vmem:[#allocation2 + $0x8] ss:$16 sps:$4 sm:$0xff]  }
  0xcb   :  { %1517 = vmatpush2.bf16.msra.mxu0 %v2975_v58  ;;  %v3067_v58 = vld [vmem:[#allocation2 + $0x1e4] ss:$16 sps:$4 sm:$0xff]  }
  0xcc   :  { %1560 = vmatpush2.bf16.msra.mxu1 %v2978_v59  ;;  %1518 = vmatprep.subr.bf16.mxu0 %v2983_v60  ;;  %v3070_v59 = vld [vmem:[#allocation2 + $0x1ec] ss:$16 sps:$4 sm:$0xff]   ;;  %v3065_v60 = vld [vmem:[#allocation2 + $0x1e0] ss:$16 sps:$4 sm:$0xff]  }
  0xcd   :  { %1561 = vmatprep.subr.bf16.mxu1 %v2986_v61  ;;  %v3068_v61 = vld [vmem:[#allocation2 + $0x1e8] ss:$16 sps:$4 sm:$0xff]  }
  0xcf   :  { %1519 = vmatpush2.bf16.msra.mxu0 %v2981_v62  ;;  %v3073_v62 = vld [vmem:[#allocation2 + $0x1c4] ss:$16 sps:$4 sm:$0xff]  }
  0xd0   :  { %1562 = vmatpush2.bf16.msra.mxu1 %v2984_v63  ;;  %1520 = vmatprep.subr.bf16.mxu0 %v2989_v0  ;;  %v3076_v63 = vld [vmem:[#allocation2 + $0x1cc] ss:$16 sps:$4 sm:$0xff]   ;;  %v3071_v0 = vld [vmem:[#allocation2 + $0x1c0] ss:$16 sps:$4 sm:$0xff]  }
  0xd1   :  { %1563 = vmatprep.subr.bf16.mxu1 %v2992_v1  ;;  %v3074_v1 = vld [vmem:[#allocation2 + $0x1c8] ss:$16 sps:$4 sm:$0xff]  }
  0xd3   :  { %1521 = vmatpush2.bf16.msra.mxu0 %v2987_v2  ;;  %v3079_v2 = vld [vmem:[#allocation2 + $0x1a4] ss:$16 sps:$4 sm:$0xff]  }
  0xd4   :  { %1564 = vmatpush2.bf16.msra.mxu1 %v2990_v3  ;;  %1522 = vmatprep.subr.bf16.mxu0 %v2995_v4  ;;  %v3082_v3 = vld [vmem:[#allocation2 + $0x1ac] ss:$16 sps:$4 sm:$0xff]   ;;  %v3077_v4 = vld [vmem:[#allocation2 + $0x1a0] ss:$16 sps:$4 sm:$0xff]  }
  0xd5   :  { %1565 = vmatprep.subr.bf16.mxu1 %v2998_v5  ;;  %v3080_v5 = vld [vmem:[#allocation2 + $0x1a8] ss:$16 sps:$4 sm:$0xff]  }
  0xd7   :  { %1523 = vmatpush2.bf16.msra.mxu0 %v2993_v6  ;;  %v3085_v6 = vld [vmem:[#allocation2 + $0x184] ss:$16 sps:$4 sm:$0xff]  }
  0xd8   :  { %1566 = vmatpush2.bf16.msra.mxu1 %v2996_v7  ;;  %1524 = vmatprep.subr.bf16.mxu0 %v3001_v9  ;;  %v3088_v7 = vld [vmem:[#allocation2 + $0x18c] ss:$16 sps:$4 sm:$0xff]   ;;  %v3086_v9 = vld [vmem:[#allocation2 + $0x188] ss:$16 sps:$4 sm:$0xff]  }
  0xd9   :  { %1567 = vmatprep.subr.bf16.mxu1 %v3004_v10  ;;  %v3091_v10 = vld [vmem:[#allocation2 + $0x164] ss:$16 sps:$4 sm:$0xff]  }
  0xdb   :  { %1525 = vmatpush2.bf16.msra.mxu0 %v2999_v17  ;;  %v3097_v17 = vld [vmem:[#allocation2 + $0x144] ss:$16 sps:$4 sm:$0xff]  }
  0xdc   :  { %1568 = vmatpush2.bf16.msra.mxu1 %v3002_v18  ;;  %1526 = vmatprep.subr.bf16.mxu0 %v3007_v19  ;;  %v3100_v18 = vld [vmem:[#allocation2 + $0x14c] ss:$16 sps:$4 sm:$0xff]   ;;  %v3095_v19 = vld [vmem:[#allocation2 + $0x140] ss:$16 sps:$4 sm:$0xff]  }
  0xdd   :  { %1569 = vmatprep.subr.bf16.mxu1 %v3010_v20  ;;  %v3098_v20 = vld [vmem:[#allocation2 + $0x148] ss:$16 sps:$4 sm:$0xff]  }
  0xdf   :  { %1527 = vmatpush2.bf16.msra.mxu0 %v3005_v21  ;;  %v3103_v21 = vld [vmem:[#allocation2 + $0x124] ss:$16 sps:$4 sm:$0xff]  }
  0xe0   :  { %1570 = vmatpush2.bf16.msra.mxu1 %v3008_v23  ;;  %1528 = vmatprep.subr.bf16.mxu0 %v3013_v24  ;;  %v3106_v23 = vld [vmem:[#allocation2 + $0x12c] ss:$16 sps:$4 sm:$0xff]   ;;  %v3101_v24 = vld [vmem:[#allocation2 + $0x120] ss:$16 sps:$4 sm:$0xff]  }
  0xe1   :  { %1571 = vmatprep.subr.bf16.mxu1 %v3016_v25  ;;  %v3104_v25 = vld [vmem:[#allocation2 + $0x128] ss:$16 sps:$4 sm:$0xff]  }
  0xe3   :  { %1529 = vmatpush2.bf16.msra.mxu0 %v3011_v26  ;;  %v3109_v26 = vld [vmem:[#allocation2 + $0x104] ss:$16 sps:$4 sm:$0xff]  }
  0xe4   :  { %1572 = vmatpush2.bf16.msra.mxu1 %v3014_v27  ;;  %1904 = vmatprep.subr.bf16.mxu0 %v3019_v28  ;;  %v3112_v27 = vld [vmem:[#allocation2 + $0x10c] ss:$16 sps:$4 sm:$0xff]   ;;  %v3107_v28 = vld [vmem:[#allocation2 + $0x100] ss:$16 sps:$4 sm:$0xff]  }
  0xe5   :  { %1947 = vmatprep.subr.bf16.mxu1 %v3022_v29  ;;  %v3110_v29 = vld [vmem:[#allocation2 + $0x108] ss:$16 sps:$4 sm:$0xff]  }
  0xe6   :  { %1531 = vmatmul.mubr.bf16.vlgmr.msra.gmra.mxu0 %v3326_v13  ;;  %v3035_v13 = vld [vmem:[#allocation2 + $0x80] ss:$16 sps:$4 sm:$0xff]  }
  0xe7   :  { %1574 = vmatmul.mubr.bf16.vlgmr.msra.gmra.mxu1 %v3366_v22  ;;  %1905 = vmatpush1.bf16.msra.mxu0 %v3017_v30  ;;  %v3038_v22 = vld [vmem:[#allocation2 + $0x88] ss:$16 sps:$4 sm:$0xff]  }
  0xe8   :  { %1948 = vmatpush1.bf16.msra.mxu1 %v3020_v31  ;;  %1906 = vmatprep.subr.bf16.mxu0 %v3025_v32  ;;  %v3113_v30 = vld [vmem:[#allocation6 + $0x78] sm:$0xff]  }
  0xe9   :  { %1949 = vmatprep.subr.bf16.mxu1 %v3028_v33  ;;  %1936 = vmatprep.mubr.bf16.mxu0 %v103_v35  ;;  %v3114_v31 = vld [vmem:[#allocation6 + $0xf8] sm:$0xff]  }
  0xea   :  { %1979 = vmatprep.mubr.bf16.mxu1 %v103_v35  ;;  %v3115_v32 = vld [vmem:[#allocation6 + $0x38] sm:$0xff]   ;;  %v3119_v35 = vld [vmem:[#allocation6 + $0x30] sm:$0xff]  }
  0xeb   :  { %1907 = vmatpush1.bf16.msra.mxu0 %v3023_v12  ;;  %v3116_v33 = vld [vmem:[#allocation6 + $0xb8] sm:$0xff]   ;;  %v3117_v12 = vld [vmem:[#allocation6 + $0x70] sm:$0xff]  }
  0xec   :  { %1950 = vmatpush1.bf16.msra.mxu1 %v3026_v34  ;;  %1908 = vmatprep.subr.bf16.mxu0 %v3031_v36  ;;  %v3118_v34 = vld [vmem:[#allocation6 + $0xf0] sm:$0xff]  }
  0xed   :  { %1951 = vmatprep.subr.bf16.mxu1 %v3034_v37  ;;  %v3120_v36 = vld [vmem:[#allocation6 + $0xb0] sm:$0xff]   ;;  %v3121_v37 = vld [vmem:[#allocation6 + $0x68] sm:$0xff]  }
  0xef   :  { %1909 = vmatpush1.bf16.msra.mxu0 %v3029_v38  ;;  %v3122_v38 = vld [vmem:[#allocation6 + $0xe8] sm:$0xff]  }
  0xf0   :  { %1952 = vmatpush1.bf16.msra.mxu1 %v3032_v55  ;;  %1910 = vmatprep.subr.bf16.mxu0 %v3037_v39  ;;  %v3123_v55 = vld [vmem:[#allocation6 + $0x28] sm:$0xff]   ;;  %v3125_v39 = vld [vmem:[#allocation6 + $0x60] sm:$0xff]  }
  0xf1   :  { %1953 = vmatprep.subr.bf16.mxu1 %v3040_v40  ;;  %v3126_v40 = vld [vmem:[#allocation6 + $0xe0] sm:$0xff]  }
  0xf3   :  { %1911 = vmatpush1.bf16.msra.mxu0 %v3035_v13  ;;  %v3127_v13 = vld [vmem:[#allocation6 + $0x20] sm:$0xff]  }
  0xf4   :  { %1954 = vmatpush1.bf16.msra.mxu1 %v3038_v22  ;;  %1912 = vmatprep.subr.bf16.mxu0 %v3043_v41  ;;  %v3128_v22 = vld [vmem:[#allocation6 + $0xa0] sm:$0xff]   ;;  %v3129_v41 = vld [vmem:[#allocation6 + $0x58] sm:$0xff]  }
  0xf5   :  { %1955 = vmatprep.subr.bf16.mxu1 %v3046_v42  ;;  %v3130_v42 = vld [vmem:[#allocation6 + $0xd8] sm:$0xff]  }
  0xf7   :  { %1913 = vmatpush1.bf16.msra.mxu0 %v3041_v43  ;;  %v3131_v43 = vld [vmem:[#allocation6 + $0x18] sm:$0xff]  }
  0xf8   :  { %1956 = vmatpush1.bf16.msra.mxu1 %v3044_v44  ;;  %1914 = vmatprep.subr.bf16.mxu0 %v3049_v45  ;;  %v3132_v44 = vld [vmem:[#allocation6 + $0x98] sm:$0xff]   ;;  %v3133_v45 = vld [vmem:[#allocation6 + $0x50] sm:$0xff]  }
  0xf9   :  { %1957 = vmatprep.subr.bf16.mxu1 %v3052_v46  ;;  %v3134_v46 = vld [vmem:[#allocation6 + $0xd0] sm:$0xff]  }
  0xfb   :  { %1915 = vmatpush1.bf16.msra.mxu0 %v3047_v47  ;;  %v3135_v47 = vld [vmem:[#allocation6 + $0x10] sm:$0xff]  }
  0xfc   :  { %1958 = vmatpush1.bf16.msra.mxu1 %v3050_v48  ;;  %1916 = vmatprep.subr.bf16.mxu0 %v3055_v49  ;;  %v3136_v48 = vld [vmem:[#allocation6 + $0x90] sm:$0xff]   ;;  %v3137_v49 = vld [vmem:[#allocation6 + $0x48] sm:$0xff]  }
  0xfd   :  { %1959 = vmatprep.subr.bf16.mxu1 %v3058_v50  ;;  %v3138_v50 = vld [vmem:[#allocation6 + $0xc8] sm:$0xff]  }
  0xff   :  { %1917 = vmatpush1.bf16.msra.mxu0 %v3053_v51  ;;  %v3139_v51 = vld [vmem:[#allocation6 + $0x8] sm:$0xff]  }
 0x100   :  { %1960 = vmatpush1.bf16.msra.mxu1 %v3056_v52  ;;  %1918 = vmatprep.subr.bf16.mxu0 %v3061_v53  ;;  %v3140_v52 = vld [vmem:[#allocation6 + $0x88] sm:$0xff]   ;;  %v3141_v53 = vld [vmem:[#allocation6 + $0x40] sm:$0xff]  }
 0x101   :  { %1961 = vmatprep.subr.bf16.mxu1 %v3064_v54  ;;  %v3142_v54 = vld [vmem:[#allocation6 + $0xc0] sm:$0xff]  }
 0x103   :  { %1919 = vmatpush1.bf16.msra.mxu0 %v3059_v56  ;;  %v3143_v56 = vld [vmem:[#allocation6] sm:$0xff]  }
 0x104   :  { %1962 = vmatpush1.bf16.msra.mxu1 %v3062_v57  ;;  %1920 = vmatprep.subr.bf16.mxu0 %v3067_v58  ;;  %v3144_v57 = vld [vmem:[#allocation6 + $0x80] sm:$0xff]  }
 0x105   :  { %1963 = vmatprep.subr.bf16.mxu1 %v3070_v59 }
 0x107   :  { %1921 = vmatpush2.bf16.msra.mxu0 %v3065_v60 }
 0x108   :  { %1964 = vmatpush2.bf16.msra.mxu1 %v3068_v61  ;;  %1922 = vmatprep.subr.bf16.mxu0 %v3073_v62 }
 0x109   :  { %1965 = vmatprep.subr.bf16.mxu1 %v3076_v63 }
 0x10b   :  { %1923 = vmatpush2.bf16.msra.mxu0 %v3071_v0 }
 0x10c   :  { %1966 = vmatpush2.bf16.msra.mxu1 %v3074_v1  ;;  %1924 = vmatprep.subr.bf16.mxu0 %v3079_v2 }
 0x10d   :  { %1967 = vmatprep.subr.bf16.mxu1 %v3082_v3 }
 0x10f   :  { %1925 = vmatpush2.bf16.msra.mxu0 %v3077_v4 }
 0x110   :  { %1968 = vmatpush2.bf16.msra.mxu1 %v3080_v5  ;;  %1926 = vmatprep.subr.bf16.mxu0 %v3085_v6 }
 0x111   :  { %1969 = vmatprep.subr.bf16.mxu1 %v3088_v7 }
 0x113   :  { %1927 = vmatpush2.bf16.msra.mxu0 %v3083_v8 }
 0x114   :  { %1970 = vmatpush2.bf16.msra.mxu1 %v3086_v9  ;;  %1928 = vmatprep.subr.bf16.mxu0 %v3091_v10 }
 0x115   :  { %1971 = vmatprep.subr.bf16.mxu1 %v3094_v11 }
 0x117   :  { %1929 = vmatpush2.bf16.msra.mxu0 %v3089_v14 }
 0x118   :  { %1972 = vmatpush2.bf16.msra.mxu1 %v3092_v15  ;;  %1930 = vmatprep.subr.bf16.mxu0 %v3097_v17  ;;  %v1992_v17 = vlaneseq }
 0x119   :  { %1973 = vmatprep.subr.bf16.mxu1 %v3100_v18 }
 0x11b   :  { %1931 = vmatpush2.bf16.msra.mxu0 %v3095_v19 }
 0x11c   :  { %1974 = vmatpush2.bf16.msra.mxu1 %v3098_v20  ;;  %1932 = vmatprep.subr.bf16.mxu0 %v3103_v21  ;;  %v1993_v20 = vshrl.u32 %v1992_v17, 7 }
 0x11d   :  { %1975 = vmatprep.subr.bf16.mxu1 %v3106_v23 }
 0x11f   :  { %1933 = vmatpush2.bf16.msra.mxu0 %v3101_v24 }
 0x120   :  { %1976 = vmatpush2.bf16.msra.mxu1 %v3104_v25  ;;  %1934 = vmatprep.subr.bf16.mxu0 %v3109_v26  ;;  %v1994_v26 = vsub.s32 0, %v1993_v20 }
 0x121   :  { %1977 = vmatprep.subr.bf16.mxu1 %v3112_v27  ;;  %v2002_v27 = vsub.s32 2, %v1993_v20 }
 0x123   :  { %1935 = vmatpush2.bf16.msra.mxu0 %v3107_v28 }
 0x124   :  { %1978 = vmatpush2.bf16.msra.mxu1 %v3110_v29  ;;  %2678 = vmatprep.subr.bf16.mxu0 %v3113_v30  ;;  %v1990_v29 = vld [vmem:[%s3418_s4] sm:$0xf]  ;;  %v1998_v30 = vsub.s32 1, %v1993_v20 }
 0x125   :  { %2700 = vmatprep.subr.bf16.mxu1 %v3114_v31  ;;  %v2006_v31 = vsub.s32 3, %v1993_v20 }
 0x126   :  { %1937 = vmatmul.mubr.bf16.vlgmr.msra.gmra.mxu0 %v3396_v16  ;;  %v1360_v58 = vpop.f32.mrf.mxu0 }
 0x127   :  { %1980 = vmatmul.mubr.bf16.vlgmr.msra.gmra.mxu1 %v3396_v16  ;;  %2679 = vmatpush3.bf16.msra.mxu0 %v3115_v32  ;;  %v3124_v16 = vld [vmem:[#allocation6 + $0xa8] sm:$0xff]   ;;  %v1403_v59 = vpop.f32.mrf.mxu1 }
 0x128   :  { %2701 = vmatpush3.bf16.msra.mxu1 %v3116_v33  ;;  %2680 = vmatprep.subr.bf16.mxu0 %v3117_v12  ;;  %v1362_v60 = vpop.f32.mrf.mxu0  ;;  %v1404_v32 = vadd.f32 %v1403_v59, %v1360_v58 }
 0x129   :  { %2702 = vmatprep.subr.bf16.mxu1 %v3118_v34  ;;  %v1405_v61 = vpop.f32.mrf.mxu1 }
 0x12a   :  { %v1364_v62 = vpop.f32.mrf.mxu0  ;;  %v1406_v28 = vadd.f32 %v1405_v61, %v1362_v60 }
 0x12b   :  { %2681 = vmatpush3.bf16.msra.mxu0 %v3119_v35  ;;  %v1407_v63 = vpop.f32.mrf.mxu1 }
 0x12c   :  { %2703 = vmatpush3.bf16.msra.mxu1 %v3120_v36  ;;  %2682 = vmatprep.subr.bf16.mxu0 %v3121_v37  ;;  %v1366_v0 = vpop.f32.mrf.mxu0  ;;  %v1408_v33 = vadd.f32 %v1407_v63, %v1364_v62 }
 0x12d   :  { %2704 = vmatprep.subr.bf16.mxu1 %v3122_v38  ;;  %v1409_v1 = vpop.f32.mrf.mxu1 }
 0x12e   :  { %v1410_v36 = vadd.f32 %v1409_v1, %v1366_v0 }
 0x12f   :  { %2683 = vmatpush3.bf16.msra.mxu0 %v3123_v55 }
 0x130   :  { %2705 = vmatpush3.bf16.msra.mxu1 %v3124_v16  ;;  %2684 = vmatprep.subr.bf16.mxu0 %v3125_v39 }
 0x131   :  { %2706 = vmatprep.subr.bf16.mxu1 %v3126_v40  ;;  %v1995_v40 = vrot.slane %v1990_v29, %v1994_v26 }
 0x133   :  { %2685 = vmatpush3.bf16.msra.mxu0 %v3127_v13  ;;  %v2003_v13 = vrot.slane %v1990_v29, %v2002_v27 }
 0x134   :  { %2707 = vmatpush3.bf16.msra.mxu1 %v3128_v22  ;;  %2686 = vmatprep.subr.bf16.mxu0 %v3129_v41 }
 0x135   :  { %2708 = vmatprep.subr.bf16.mxu1 %v3130_v42 }
 0x137   :  { %2687 = vmatpush3.bf16.msra.mxu0 %v3131_v43  ;;  %v1999_v43 = vrot.slane %v1990_v29, %v1998_v30 }
 0x138   :  { %2709 = vmatpush3.bf16.msra.mxu1 %v3132_v44  ;;  %2688 = vmatprep.subr.bf16.mxu0 %v3133_v45  ;;  %v2007_v45 = vrot.slane %v1990_v29, %v2006_v31 }
 0x139   :  { %2710 = vmatprep.subr.bf16.mxu1 %v3134_v46 }
 0x13b   :  { %2689 = vmatpush3.bf16.msra.mxu0 %v3135_v47 }
 0x13c   :  { %2711 = vmatpush3.bf16.msra.mxu1 %v3136_v48  ;;  %2690 = vmatprep.subr.bf16.mxu0 %v3137_v49 }
 0x13d   :  { %2712 = vmatprep.subr.bf16.mxu1 %v3138_v50 }
 0x13f   :  { %2691 = vmatpush3.bf16.msra.mxu0 %v3139_v51 }
 0x140   :  { %2713 = vmatpush3.bf16.msra.mxu1 %v3140_v52  ;;  %2692 = vmatprep.subr.bf16.mxu0 %v3141_v53 }
 0x141   :  { %2714 = vmatprep.subr.bf16.mxu1 %v3142_v54 }
 0x143   :  { %2693 = vmatpush3.bf16.msra.mxu0 %v3143_v56 }
 0x144   :  { %2715 = vmatpush3.bf16.msra.mxu1 %v3144_v57 }
 0x166   :  { %v1446_v2 = vpop.f32.mrf.mxu0 }
 0x167   :  { %v1489_v3 = vpop.f32.mrf.mxu1  ;;  %v1447_v16 = vadd.f32 %v1446_v2, %v1404_v32 }
 0x168   :  { %v1448_v4 = vpop.f32.mrf.mxu0 }
 0x169   :  { %v1491_v5 = vpop.f32.mrf.mxu1  ;;  %v1449_v37 = vadd.f32 %v1448_v4, %v1406_v28 }
 0x16a   :  { %v1450_v6 = vpop.f32.mrf.mxu0 }
 0x16b   :  { %v1493_v7 = vpop.f32.mrf.mxu1  ;;  %v1451_v46 = vadd.f32 %v1450_v6, %v1408_v33 }
 0x16c   :  { %v1452_v8 = vpop.f32.mrf.mxu0 }
 0x16d   :  { %v1495_v9 = vpop.f32.mrf.mxu1  ;;  %v1453_v52 = vadd.f32 %v1452_v8, %v1410_v36 }
 0x1a6   :  { %v1532_v10 = vpop.f32.mrf.mxu0 }
 0x1a7   :  { %v1575_v11 = vpop.f32.mrf.mxu1  ;;  %v1533_v23 = vadd.f32 %v1532_v10, %v1489_v3 }
 0x1a8   :  { %v1534_v14 = vpop.f32.mrf.mxu0 }
 0x1a9   :  { %v1577_v15 = vpop.f32.mrf.mxu1  ;;  %v1535_v21 = vadd.f32 %v1534_v14, %v1491_v5  ;;  %v1576_v39 = vadd.f32 %v1575_v11, %v1533_v23  ;;  %v2645_v23 = vld [vmem:[%s3420_s6] ss:$0 sm:$0xff] }
 0x1aa   :  { %v1536_v18 = vpop.f32.mrf.mxu0 }
 0x1ab   :  { %v1579_v19 = vpop.f32.mrf.mxu1  ;;  %v1537_v12 = vadd.f32 %v1536_v18, %v1493_v7  ;;  %v1578_v38 = vadd.f32 %v1577_v15, %v1535_v21 }
 0x1ac   :  { %v1538_v24 = vpop.f32.mrf.mxu0 }
 0x1ad   :  { %v1581_v25 = vpop.f32.mrf.mxu1  ;;  %v1539_v55 = vadd.f32 %v1538_v24, %v1495_v9  ;;  %v1580_v47 = vadd.f32 %v1579_v19, %v1537_v12 }
 0x1af   :  { %v1582_v53 = vadd.f32 %v1581_v25, %v1539_v55 }
 0x1e6   :  { %v1938_v34 = vpop.f32.mrf.mxu0 }
 0x1e7   :  { %v1981_v35 = vpop.f32.mrf.mxu1  ;;  %v1939_v48 = vadd.f32 %v1938_v34, %v1447_v16 }
 0x1e8   :  { %v1940_v22 = vpop.f32.mrf.mxu0  ;;  %v1982_v49 = vadd.f32 %v1981_v35, %v1576_v39 }
 0x1e9   :  { %v1983_v41 = vpop.f32.mrf.mxu1  ;;  %v1941_v42 = vadd.f32 %v1940_v22, %v1449_v37  ;;  %v2012_v63 = vadd.f32 %v1995_v40, %v1939_v48 }
 0x1ea   :  { %v1984_v44 = vadd.f32 %v1983_v41, %v1578_v38  ;;  %v1942_v50 = vpop.f32.mrf.mxu0  ;;  %v2014_v0 = vadd.f32 %v2003_v13, %v1982_v49 }
 0x1eb   :  { %v1985_v51 = vpop.f32.mrf.mxu1  ;;  %v1943_v54 = vadd.f32 %v1942_v50, %v1451_v46  ;;  %v2013_v59 = vadd.f32 %v1999_v43, %v1941_v42  ;;  %v2020_v11 = vmax.f32 %v2012_v63, 0.0 }
 0x1ec   :  { %v1986_v56 = vadd.f32 %v1985_v51, %v1580_v47  ;;  %v1944_v57 = vpop.f32.mrf.mxu0  ;;  %v2015_v60 = vadd.f32 %v2007_v45, %v1984_v44  ;;  %v2022_v14 = vmax.f32 %v2014_v0, 0.0 }
 0x1ed   :  { %v1987_v58 = vpop.f32.mrf.mxu1  ;;  %v1945_v61 = vadd.f32 %v1944_v57, %v1453_v52  ;;  %v2016_v1 = vadd.f32 %v1995_v40, %v1943_v54  ;;  %v2021_v7 = vmax.f32 %v2013_v59, 0.0 }
 0x1ee   :  { %v1988_v62 = vadd.f32 %v1987_v58, %v1582_v53  ;;  %v2018_v2 = vadd.f32 %v2003_v13, %v1986_v56  ;;  %v2023_v9 = vmax.f32 %v2015_v60, 0.0 }
 0x1ef   :  { %v2017_v3 = vadd.f32 %v1999_v43, %v1945_v61  ;;  %v2024_v5 = vmax.f32 %v2016_v1, 0.0 }
 0x1f0   :  { %v2019_v4 = vadd.f32 %v2007_v45, %v1988_v62  ;;  %v2026_v6 = vmax.f32 %v2018_v2, 0.0 }
 0x1f1   :  { %v2025_v8 = vmax.f32 %v2017_v3, 0.0  ;;  %v2028_v18 = vpack.c.bf16 %v2024_v5, %v2020_v11 }
 0x1f2   :  { %v2027_v10 = vmax.f32 %v2019_v4, 0.0  ;;  %v2030_v19 = vpack.c.bf16 %v2026_v6, %v2022_v14 }
 0x1f3   :  { %v2029_v15 = vpack.c.bf16 %v2025_v8, %v2021_v7 }
 0x1f4   :  { %v2031_v17 = vpack.c.bf16 %v2027_v10, %v2023_v9 }
 0x1f5   :  { %2327 = vmatprep.mubr.bf16.mxu0 %v2029_v15 }
 0x1f6   :  { %2368 = vmatprep.mubr.bf16.mxu1 %v2031_v17  ;;  %2328 = vmatmul.mubr.bf16.vlgmr.msra.gmra.mxu0 %v2028_v18 }
 0x1f7   :  { %2369 = vmatmul.mubr.bf16.vlgmr.msra.gmra.mxu1 %v2030_v19 }
 0x2b6   :  { %v2694_v20 = vpop.f32.mrf.mxu0 }
 0x2b7   :  { %v2716_v21 = vpop.f32.mrf.mxu1 }
 0x2b8   :  { %v2695_v24 = vpop.f32.mrf.mxu0 }
 0x2b9   :  { %v2717_v25 = vpop.f32.mrf.mxu1  ;;  %v2696_v26 = vadd.f32 %v2695_v24, %v2694_v20 }
 0x2ba   :  { %v2697_v27 = vpop.f32.mrf.mxu0  ;;  %v2718_v30 = vadd.f32 %v2717_v25, %v2716_v21 }
 0x2bb   :  { %v2719_v28 = vpop.f32.mrf.mxu1  ;;  %v2330_v29 = vadd.f32 %v2696_v26, %v2645_v23 }
 0x2bc   :  { %v2698_v31 = vpop.f32.mrf.mxu0 }
 0x2bd   :  { %v2720_v32 = vpop.f32.mrf.mxu1  ;;  %v2371_v33 = vadd.f32 %v2718_v30, %v2330_v29  ;;  %v2699_v12 = vadd.f32 %v2698_v31, %v2697_v27 }
 0x2be   :  { %v2721_v35 = vadd.f32 %v2720_v32, %v2719_v28 }
 0x2bf   :  { %2377 = vst [vmem:[%s3422_s8] sm:$0xff] %v2371_v33  ;;  %v2333_v34 = vadd.f32 %v2699_v12, %v2645_v23 }
 0x2c1   :  { %v2374_v36 = vadd.f32 %v2721_v35, %v2333_v34 }
 0x2c3   :  { %2378 = vst [vmem:[%s3422_s8 + $0x8] sm:$0xff] %v2374_v36 }
 0x2c4   :  { %2387 = vsyncpa [#allocation3], 1 }
 0x2c5   :  { %2388 = vsyncpa [#allocation5], 1 }

</bundles_post_ra>
